<compile_context>
chip_gen: v6e
topology: v6e:2x2x1
jax: 0.10.0
libtpu: 0.0.40
codegen_flags: <defaults>
</compile_context>

<pallas_src>
import functools
import math

import jax
import jax.numpy as jnp
from jax import lax
from jax.experimental import pallas as pl
from jax.experimental.pallas import tpu as pltpu

PAD = 128           # node-axis padding (N <= 100 here)
CHAN_ALIGN = 16     # channel / contraction dims padded to a multiple of this

_VMEM = pl.BlockSpec(memory_space=pltpu.MemorySpace.VMEM)


def _round_up(v, m):
    return ((v + m - 1) // m) * m


def _pad2(a, rows, cols, dtype=jnp.float32):
    out = jnp.zeros((rows, cols), dtype)
    return out.at[: a.shape[0], : a.shape[1]].set(a.astype(dtype))


# ----------------------------------------------------------------------------
# Pallas kernels
# ----------------------------------------------------------------------------

def _conv_body(a_base_ref, dinv_ref, x_ref, w_ref, b_ref):
    """relu( dinv * (A_base @ (dinv * (X @ W))) + b ), pad rows forced to 0.

    A_base (bf16, [target, source], remaining self-loops included) and
    dinv = deg^-1/2 (f32, (PAD, 1), 0 on pad rows) are precomputed outside.
    """
    f32, bf16 = jnp.float32, jnp.bfloat16
    dinv = dinv_ref[...]                                          # (PAD, 1)
    xw = jnp.dot(x_ref[...].astype(bf16), w_ref[...],
                 preferred_element_type=f32)                      # (PAD, cout)
    msg = jnp.dot(a_base_ref[...], (dinv * xw).astype(bf16),
                  preferred_element_type=f32)                     # (PAD, cout)
    mask = (dinv > 0.0).astype(f32)          # real nodes have deg >= 1
    return jnp.maximum(dinv * msg + b_ref[...], 0.0) * mask


def _gcn_kernel(a_base_ref, dinv_ref, x_ref, w_ref, b_ref, h_ref):
    h_ref[...] = _conv_body(a_base_ref, dinv_ref, x_ref, w_ref, b_ref)


def _gcn_score_kernel(a_base_ref, a_t_ref, dinv_ref, x_ref, w_ref, b_ref,
                      wrel_ref, wroot_ref, brel_ref, h_ref, s_ref):
    """Fused GCNConv+relu and the SAGPooling scorer (GraphConv + tanh).

    Scorer (associativity + lane-dense rows):
        hr[s]    = h[s, :] . w_rel          -> (1, PAD) row
        hroot[t] = h[t, :] . w_root         -> (1, PAD) row
        s[t]     = tanh( sum_s A_raw[t, s] * hr[s] + hroot[t] + b_rel )
    a_t_ref holds A_raw transposed ([source, target]) so the aggregation is a
    (1,128) @ (128,128) matmul whose result is already a lane-dense row.
    """
    f32, bf16 = jnp.float32, jnp.bfloat16
    h = _conv_body(a_base_ref, dinv_ref, x_ref, w_ref, b_ref)
    h_ref[...] = h
    h_bf = h.astype(bf16)
    dn = (((1,), (1,)), ((), ()))            # contract both channel axes
    hr_row = lax.dot_general(wrel_ref[...], h_bf, dn,
                             preferred_element_type=f32)          # (1, PAD)
    hroot_row = lax.dot_general(wroot_ref[...], h_bf, dn,
                                preferred_element_type=f32)       # (1, PAD)
    agg_row = jnp.dot(hr_row.astype(bf16), a_t_ref[...],
                      preferred_element_type=f32)                 # (1, PAD)
    s_ref[...] = jnp.tanh(agg_row + hroot_row + brel_ref[...])


def gcn_conv(a_base, dinv, x_pad, w, b):
    cout = w.shape[1]
    return pl.pallas_call(
        _gcn_kernel,
        out_shape=jax.ShapeDtypeStruct((PAD, cout), jnp.float32),
        in_specs=[_VMEM] * 5,
        out_specs=_VMEM,
    )(a_base, dinv, x_pad, w, b)


def gcn_conv_and_score(a_base, a_t, dinv, x_pad, w, b, sp):
    cout = w.shape[1]
    h, s = pl.pallas_call(
        _gcn_score_kernel,
        out_shape=(jax.ShapeDtypeStruct((PAD, cout), jnp.float32),
                   jax.ShapeDtypeStruct((1, PAD), jnp.float32)),
        in_specs=[_VMEM] * 9,
        out_specs=(_VMEM, _VMEM),
    )(a_base, a_t, dinv, x_pad, w, b, sp["w_rel"], sp["w_root"], sp["b_rel"])
    return h, s[0]          # score as a flat (PAD,) vector


# ----------------------------------------------------------------------------
# Plain-JAX glue: adjacency/norm build, SAG pooling bookkeeping, unpool
# ----------------------------------------------------------------------------

def build_operands(edge_index, edge_valid, n):
    """Dense GCN operands via MXU-friendly one-hot matmuls (no scatter-add).

    Returns
      a_base : (PAD,PAD) bf16, A[target,source] with PyG remaining self-loops
      a_t    : (PAD,PAD) bf16, raw adjacency transposed ([source,target]), for
               the SAGPooling GraphConv scorer
      dinv   : (PAD,1)  f32, deg^-1/2 per target row, 0 on pad rows
    All adjacency values are small integer counts => exact in bf16.
    """
    src, tgt = edge_index[0], edge_index[1]
    w = edge_valid.astype(jnp.bfloat16)
    ids = jnp.arange(PAD, dtype=jnp.int32)
    oh_src = (src[:, None] == ids[None, :]).astype(jnp.bfloat16)   # (E, PAD)
    oh_tgt = (tgt[:, None] == ids[None, :]).astype(jnp.bfloat16)   # (E, PAD)
    a_raw = jnp.dot(oh_tgt.T, w[:, None] * oh_src,
                    preferred_element_type=jnp.float32)            # A[t, s]
    node_mask = (ids < n).astype(jnp.float32)
    selfw = jnp.diagonal(a_raw)
    # add_remaining_self_loops: nodes WITHOUT a self loop get one of weight 1
    add_diag = node_mask * (selfw == 0.0).astype(jnp.float32)
    a_base = a_raw + jnp.diag(add_diag)
    deg = jnp.sum(a_base, axis=1, keepdims=True)
    dinv = jnp.where(deg > 0.0, lax.rsqrt(jnp.maximum(deg, 1.0)), 0.0)
    return (a_base.astype(jnp.bfloat16),
            a_raw.T.astype(jnp.bfloat16),
            dinv)


def sag_pool_with_score(x_pad, score, edge_index, edge_valid, n, ratio=0.5):
    """SAGPooling bookkeeping on PAD-padded arrays (score computed in-kernel).

    Returns (x_pooled_scaled, x_gathered_unscaled, new_edge_index, new_valid,
    k, perm); node features stay (PAD, C) with rows >= k zeroed.
    """
    k = math.ceil(ratio * n)                       # static Python int
    ids = jnp.arange(PAD, dtype=jnp.int32)
    score_m = jnp.where(ids < n, score, -2.0)      # tanh scores are in (-1, 1)
    _, perm = lax.top_k(score_m, k)                # descending, like PyG topk
    perm = perm.astype(jnp.int32)
    perm_full = jnp.concatenate([perm, jnp.zeros((PAD - k,), jnp.int32)])
    sel = (ids < k).astype(jnp.float32)[:, None]
    x_gather = x_pad[perm_full] * sel                              # unscaled
    gain = jnp.where(ids < k, score[perm_full], 0.0)[:, None]
    x_pooled = x_gather * gain                                     # PyG scaling
    # filter_adj: keep edges with both endpoints selected, relabel to [0, k)
    relabel = jnp.full((PAD,), -1, jnp.int32).at[perm].set(
        jnp.arange(k, dtype=jnp.int32))
    nrow = relabel[edge_index[0]]
    ncol = relabel[edge_index[1]]
    new_valid = edge_valid & (nrow >= 0) & (ncol >= 0)
    nrow = jnp.where(new_valid, nrow, 0)
    ncol = jnp.where(new_valid, ncol, 0)
    new_edge_index = jnp.stack([nrow, ncol], axis=0)
    return x_pooled, x_gather, new_edge_index, new_valid, k, perm


def unpool_edges(edge_index_cg, perm):
    rev_perm = jnp.argsort(perm).astype(jnp.int32)
    return jnp.stack([rev_perm[edge_index_cg[0]],
                      rev_perm[edge_index_cg[1]]], axis=0)


# ----------------------------------------------------------------------------
# GraphUNet
# ----------------------------------------------------------------------------

def init_params(key, input_channels, hidden, output_channels, depth):
    def lin(key, cin, cout):
        return jax.random.normal(key, (cin, cout), jnp.float32) / jnp.sqrt(cin)

    def conv_w(key, cin, cout):      # padded once to (round_up(cin,16), cout), bf16
        return _pad2(lin(key, cin, cout), _round_up(cin, CHAN_ALIGN), cout,
                     jnp.bfloat16)

    def scorer(key_a, key_b, cin):   # GraphConv(cin, 1): weights stored as rows
        return {"w_rel": lin(key_a, cin, 1).T.astype(jnp.bfloat16),    # (1, cin)
                "w_root": lin(key_b, cin, 1).T.astype(jnp.bfloat16),   # (1, cin)
                "b_rel": jnp.zeros((1, 1), jnp.float32)}

    keys = iter(jax.random.split(key, 64))
    params = {"down_w": [], "down_b": [], "pool": [], "unpool": [],
              "up_w": [], "up_b": []}
    params["down_w"].append(conv_w(next(keys), input_channels, hidden))
    params["down_b"].append(jnp.zeros((1, hidden), jnp.float32))
    for _ in range(depth - 1):
        params["pool"].append(scorer(next(keys), next(keys), hidden))
        params["down_w"].append(conv_w(next(keys), hidden, hidden))
        params["down_b"].append(jnp.zeros((1, hidden), jnp.float32))
    for _ in range(depth - 1):
        params["unpool"].append(scorer(next(keys), next(keys), hidden))
        params["up_w"].append(conv_w(next(keys), 2 * hidden, hidden))
        params["up_b"].append(jnp.zeros((1, hidden), jnp.float32))
    # final up_conv (hidden -> output_channels) exists in __init__ but is never
    # used by the reference forward(); created for shape parity only.
    params["up_w"].append(conv_w(next(keys), hidden, output_channels))
    params["up_b"].append(jnp.zeros((1, output_channels), jnp.float32))
    return params


def graph_unet_forward(params, x, edge_index, depth):
    num_edges = edge_index.shape[1]
    edge_valid = jnp.ones((num_edges,), jnp.bool_)
    n = x.shape[0]                               # static per level

    # Node features stay (PAD, C) for the entire forward.
    x = _pad2(x, PAD, params["down_w"][0].shape[0])

    skips = []
    pending_score = None

    # Down path.  Every conv except the very last up-conv is immediately
    # followed by exactly one SAGPooling scorer on its output with the same
    # edges, so conv + scorer are fused into one pallas_call.
    for i in range(depth):
        a_base, a_t, dinv = build_operands(edge_index, edge_valid, n)
        if i != depth - 1:
            sp = params["pool"][i]           # pools[i] scores down_convs[i] output
        elif depth > 1:
            sp = params["unpool"][0]         # unpools[0] scores the bottom conv
        else:
            sp = None
        if sp is not None:
            x, score = gcn_conv_and_score(a_base, a_t, dinv, x,
                                          params["down_w"][i],
                                          params["down_b"][i], sp)
        else:
            x = gcn_conv(a_base, dinv, x, params["down_w"][i], params["down_b"][i])
            score = None
        skips.append(x)                      # (PAD, hidden), pad rows == 0
        if i != depth - 1:
            x, _, edge_index, edge_valid, n, _ = sag_pool_with_score(
                x, score, edge_index, edge_valid, n)
        else:
            pending_score = score

    # "Up" path (PoolUnpoolGraph actually pools again, as in the reference).
    for i in range(depth - 1):
        _, x_unpooled, edge_index_cg, edge_valid_cg, k, perm = sag_pool_with_score(
            x, pending_score, edge_index, edge_valid, n)
        x = x_unpooled                       # x[perm], unscaled, padded
        edge_index = unpool_edges(edge_index_cg, perm)
        edge_valid = edge_valid_cg
        n = k

        skip = skips[-(i + 1)]
        # reference: skip = skip[:x.size(0)]; padded arrays keep node j in row j,
        # so just zero out the rows >= n (they never propagate anyway).
        skip = jnp.where(jnp.arange(PAD)[:, None] < n, skip, 0.0)
        x = jnp.concatenate([x, skip], axis=1)           # (PAD, 2*hidden)

        a_base, a_t, dinv = build_operands(edge_index, edge_valid, n)
        if i != depth - 2:
            # fuse the next unpool's scorer into this up-conv
            x, pending_score = gcn_conv_and_score(
                a_base, a_t, dinv, x, params["up_w"][i], params["up_b"][i],
                params["unpool"][i + 1])
        else:
            x = gcn_conv(a_base, dinv, x, params["up_w"][i], params["up_b"][i])
    return x[:n]


# ----------------------------------------------------------------------------

if __name__ == "__main__":
    INPUT_CHANNELS = 1
    HIDDEN = 16
    OUTPUT_CHANNELS = 4   # unused by the reference forward()
    DEPTH = 3
    N_NODES = 100
    N_EDGES = 200

    key = jax.random.PRNGKey(0)
    k_x, k_e, k_p = jax.random.split(key, 3)
    x = jax.random.normal(k_x, (N_NODES, INPUT_CHANNELS), jnp.float32)
    edge_index = jax.random.randint(k_e, (2, N_EDGES), 0, N_NODES, jnp.int32)

    params = init_params(k_p, INPUT_CHANNELS, HIDDEN, OUTPUT_CHANNELS, DEPTH)

    forward = jax.jit(functools.partial(graph_unet_forward, depth=DEPTH))
    out = forward(params, x, edge_index)
    out = jax.block_until_ready(out)
    assert out.shape == (7, HIDDEN), out.shape  # 100 ->50 ->25 ->13 ->7 nodes
    assert bool(jnp.all(jnp.isfinite(out)))
    print("KERNEL_OK")
</pallas_src>

<mosaic_0001>
module attributes {stable_mosaic.version = 11 : i64} {
  func.func @_gcn_score_kernel(%arg0: memref<128x128xbf16, #tpu.memory_space<vmem>>, %arg1: memref<128x128xbf16, #tpu.memory_space<vmem>>, %arg2: memref<128x1xf32, #tpu.memory_space<vmem>>, %arg3: memref<128x16xf32, #tpu.memory_space<vmem>>, %arg4: memref<16x16xbf16, #tpu.memory_space<vmem>>, %arg5: memref<1x16xf32, #tpu.memory_space<vmem>>, %arg6: memref<1x16xbf16, #tpu.memory_space<vmem>>, %arg7: memref<1x16xbf16, #tpu.memory_space<vmem>>, %arg8: memref<1x1xf32, #tpu.memory_space<vmem>>, %arg9: memref<128x16xf32, #tpu.memory_space<vmem>>, %arg10: memref<1x128xf32, #tpu.memory_space<vmem>>) attributes {dimension_semantics = [], scalar_prefetch = 0 : i64, scratch_operands = 0 : i64, tpu.core_type = #tpu.core_type<tc>} {
    %c0 = arith.constant 0 : index
    %c0_0 = arith.constant 0 : index
    %0 = vector.load %arg2[%c0, %c0_0] : memref<128x1xf32, #tpu.memory_space<vmem>>, vector<128x1xf32>
    %c0_1 = arith.constant 0 : index
    %c0_2 = arith.constant 0 : index
    %1 = vector.load %arg3[%c0_1, %c0_2] : memref<128x16xf32, #tpu.memory_space<vmem>>, vector<128x16xf32>
    %2 = arith.truncf %1 : vector<128x16xf32> to vector<128x16xbf16>
    %c0_3 = arith.constant 0 : index
    %c0_4 = arith.constant 0 : index
    %3 = vector.load %arg4[%c0_3, %c0_4] : memref<16x16xbf16, #tpu.memory_space<vmem>>, vector<16x16xbf16>
    %cst = arith.constant dense<0.000000e+00> : vector<128x16xf32>
    %4 = tpu.matmul %2, %3, %cst {dimension_numbers = #tpu.dot_dimension_numbers<[1], [0], [0], [1], [0, 0, 1, 1], [], []>} : vector<128x16xbf16>, vector<16x16xbf16>, vector<128x16xf32> -> vector<128x16xf32>
    %c0_5 = arith.constant 0 : index
    %c0_6 = arith.constant 0 : index
    %5 = vector.load %arg0[%c0_5, %c0_6] : memref<128x128xbf16, #tpu.memory_space<vmem>>, vector<128x128xbf16>
    %6 = vector.broadcast %0 : vector<128x1xf32> to vector<128x16xf32>
    %7 = arith.mulf %6, %4 : vector<128x16xf32>
    %8 = arith.truncf %7 : vector<128x16xf32> to vector<128x16xbf16>
    %cst_7 = arith.constant dense<0.000000e+00> : vector<128x16xf32>
    %9 = tpu.matmul %5, %8, %cst_7 {dimension_numbers = #tpu.dot_dimension_numbers<[1], [0], [0], [1], [0, 0, 1, 1], [], []>} : vector<128x128xbf16>, vector<128x16xbf16>, vector<128x16xf32> -> vector<128x16xf32>
    %cst_8 = arith.constant 0.000000e+00 : f32
    %10 = vector.broadcast %cst_8 : f32 to vector<128x1xf32>
    %11 = arith.cmpf ogt, %0, %10 : vector<128x1xf32>
    %12 = arith.extui %11 : vector<128x1xi1> to vector<128x1xi32>
    %13 = arith.sitofp %12 : vector<128x1xi32> to vector<128x1xf32>
    %14 = vector.broadcast %0 : vector<128x1xf32> to vector<128x16xf32>
    %15 = arith.mulf %14, %9 : vector<128x16xf32>
    %c0_9 = arith.constant 0 : index
    %c0_10 = arith.constant 0 : index
    %16 = vector.load %arg5[%c0_9, %c0_10] : memref<1x16xf32, #tpu.memory_space<vmem>>, vector<1x16xf32>
    %17 = vector.broadcast %16 : vector<1x16xf32> to vector<128x16xf32>
    %18 = arith.addf %15, %17 : vector<128x16xf32>
    %cst_11 = arith.constant 0.000000e+00 : f32
    %19 = vector.broadcast %cst_11 : f32 to vector<128x16xf32>
    %20 = arith.maximumf %18, %19 : vector<128x16xf32>
    %21 = vector.broadcast %13 : vector<128x1xf32> to vector<128x16xf32>
    %22 = arith.mulf %20, %21 : vector<128x16xf32>
    %c0_12 = arith.constant 0 : index
    %c0_13 = arith.constant 0 : index
    %23 = vector.load %arg9[%c0_12, %c0_13] : memref<128x16xf32, #tpu.memory_space<vmem>>, vector<128x16xf32>
    tpu.vector_store %arg9[%c0_12, %c0_13], %22 {strides = array<i32>} : memref<128x16xf32, #tpu.memory_space<vmem>>, vector<128x16xf32>,
    %24 = arith.truncf %22 : vector<128x16xf32> to vector<128x16xbf16>
    %c0_14 = arith.constant 0 : index
    %c0_15 = arith.constant 0 : index
    %25 = vector.load %arg6[%c0_14, %c0_15] : memref<1x16xbf16, #tpu.memory_space<vmem>>, vector<1x16xbf16>
    %cst_16 = arith.constant dense<0.000000e+00> : vector<1x128xf32>
    %26 = tpu.matmul %25, %24, %cst_16 {dimension_numbers = #tpu.dot_dimension_numbers<[1], [1], [0], [0], [0, 0, 1, 0], [], []>} : vector<1x16xbf16>, vector<128x16xbf16>, vector<1x128xf32> -> vector<1x128xf32>
    %c0_17 = arith.constant 0 : index
    %c0_18 = arith.constant 0 : index
    %27 = vector.load %arg7[%c0_17, %c0_18] : memref<1x16xbf16, #tpu.memory_space<vmem>>, vector<1x16xbf16>
    %cst_19 = arith.constant dense<0.000000e+00> : vector<1x128xf32>
    %28 = tpu.matmul %27, %24, %cst_19 {dimension_numbers = #tpu.dot_dimension_numbers<[1], [1], [0], [0], [0, 0, 1, 0], [], []>} : vector<1x16xbf16>, vector<128x16xbf16>, vector<1x128xf32> -> vector<1x128xf32>
    %29 = arith.truncf %26 : vector<1x128xf32> to vector<1x128xbf16>
    %c0_20 = arith.constant 0 : index
    %c0_21 = arith.constant 0 : index
    %30 = vector.load %arg1[%c0_20, %c0_21] : memref<128x128xbf16, #tpu.memory_space<vmem>>, vector<128x128xbf16>
    %cst_22 = arith.constant dense<0.000000e+00> : vector<1x128xf32>
    %31 = tpu.matmul %29, %30, %cst_22 {dimension_numbers = #tpu.dot_dimension_numbers<[1], [0], [0], [1], [0, 0, 1, 1], [], []>} : vector<1x128xbf16>, vector<128x128xbf16>, vector<1x128xf32> -> vector<1x128xf32>
    %32 = arith.addf %31, %28 : vector<1x128xf32>
    %c0_23 = arith.constant 0 : index
    %c0_24 = arith.constant 0 : index
    %33 = vector.load %arg8[%c0_23, %c0_24] : memref<1x1xf32, #tpu.memory_space<vmem>>, vector<1x1xf32>
    %34 = vector.broadcast %33 : vector<1x1xf32> to vector<1x128xf32>
    %35 = arith.addf %32, %34 : vector<1x128xf32>
    %36 = math.tanh %35 : vector<1x128xf32>
    %c0_25 = arith.constant 0 : index
    %c0_26 = arith.constant 0 : index
    %37 = vector.load %arg10[%c0_25, %c0_26] : memref<1x128xf32, #tpu.memory_space<vmem>>, vector<1x128xf32>
    tpu.vector_store %arg10[%c0_25, %c0_26], %36 {strides = array<i32>} : memref<1x128xf32, #tpu.memory_space<vmem>>, vector<1x128xf32>,
    return
  }
}

module attributes {stable_mosaic.version = 11 : i64} {
  func.func @_gcn_score_kernel(%arg0: memref<128x128xbf16, #tpu.memory_space<vmem>>, %arg1: memref<128x128xbf16, #tpu.memory_space<vmem>>, %arg2: memref<128x1xf32, #tpu.memory_space<vmem>>, %arg3: memref<128x32xf32, #tpu.memory_space<vmem>>, %arg4: memref<32x16xbf16, #tpu.memory_space<vmem>>, %arg5: memref<1x16xf32, #tpu.memory_space<vmem>>, %arg6: memref<1x16xbf16, #tpu.memory_space<vmem>>, %arg7: memref<1x16xbf16, #tpu.memory_space<vmem>>, %arg8: memref<1x1xf32, #tpu.memory_space<vmem>>, %arg9: memref<128x16xf32, #tpu.memory_space<vmem>>, %arg10: memref<1x128xf32, #tpu.memory_space<vmem>>) attributes {dimension_semantics = [], scalar_prefetch = 0 : i64, scratch_operands = 0 : i64, tpu.core_type = #tpu.core_type<tc>} {
    %c0 = arith.constant 0 : index
    %c0_0 = arith.constant 0 : index
    %0 = vector.load %arg2[%c0, %c0_0] : memref<128x1xf32, #tpu.memory_space<vmem>>, vector<128x1xf32>
    %c0_1 = arith.constant 0 : index
    %c0_2 = arith.constant 0 : index
    %1 = vector.load %arg3[%c0_1, %c0_2] : memref<128x32xf32, #tpu.memory_space<vmem>>, vector<128x32xf32>
    %2 = arith.truncf %1 : vector<128x32xf32> to vector<128x32xbf16>
    %c0_3 = arith.constant 0 : index
    %c0_4 = arith.constant 0 : index
    %3 = vector.load %arg4[%c0_3, %c0_4] : memref<32x16xbf16, #tpu.memory_space<vmem>>, vector<32x16xbf16>
    %cst = arith.constant dense<0.000000e+00> : vector<128x16xf32>
    %4 = tpu.matmul %2, %3, %cst {dimension_numbers = #tpu.dot_dimension_numbers<[1], [0], [0], [1], [0, 0, 1, 1], [], []>} : vector<128x32xbf16>, vector<32x16xbf16>, vector<128x16xf32> -> vector<128x16xf32>
    %c0_5 = arith.constant 0 : index
    %c0_6 = arith.constant 0 : index
    %5 = vector.load %arg0[%c0_5, %c0_6] : memref<128x128xbf16, #tpu.memory_space<vmem>>, vector<128x128xbf16>
    %6 = vector.broadcast %0 : vector<128x1xf32> to vector<128x16xf32>
    %7 = arith.mulf %6, %4 : vector<128x16xf32>
    %8 = arith.truncf %7 : vector<128x16xf32> to vector<128x16xbf16>
    %cst_7 = arith.constant dense<0.000000e+00> : vector<128x16xf32>
    %9 = tpu.matmul %5, %8, %cst_7 {dimension_numbers = #tpu.dot_dimension_numbers<[1], [0], [0], [1], [0, 0, 1, 1], [], []>} : vector<128x128xbf16>, vector<128x16xbf16>, vector<128x16xf32> -> vector<128x16xf32>
    %cst_8 = arith.constant 0.000000e+00 : f32
    %10 = vector.broadcast %cst_8 : f32 to vector<128x1xf32>
    %11 = arith.cmpf ogt, %0, %10 : vector<128x1xf32>
    %12 = arith.extui %11 : vector<128x1xi1> to vector<128x1xi32>
    %13 = arith.sitofp %12 : vector<128x1xi32> to vector<128x1xf32>
    %14 = vector.broadcast %0 : vector<128x1xf32> to vector<128x16xf32>
    %15 = arith.mulf %14, %9 : vector<128x16xf32>
    %c0_9 = arith.constant 0 : index
    %c0_10 = arith.constant 0 : index
    %16 = vector.load %arg5[%c0_9, %c0_10] : memref<1x16xf32, #tpu.memory_space<vmem>>, vector<1x16xf32>
    %17 = vector.broadcast %16 : vector<1x16xf32> to vector<128x16xf32>
    %18 = arith.addf %15, %17 : vector<128x16xf32>
    %cst_11 = arith.constant 0.000000e+00 : f32
    %19 = vector.broadcast %cst_11 : f32 to vector<128x16xf32>
    %20 = arith.maximumf %18, %19 : vector<128x16xf32>
    %21 = vector.broadcast %13 : vector<128x1xf32> to vector<128x16xf32>
    %22 = arith.mulf %20, %21 : vector<128x16xf32>
    %c0_12 = arith.constant 0 : index
    %c0_13 = arith.constant 0 : index
    %23 = vector.load %arg9[%c0_12, %c0_13] : memref<128x16xf32, #tpu.memory_space<vmem>>, vector<128x16xf32>
    tpu.vector_store %arg9[%c0_12, %c0_13], %22 {strides = array<i32>} : memref<128x16xf32, #tpu.memory_space<vmem>>, vector<128x16xf32>,
    %24 = arith.truncf %22 : vector<128x16xf32> to vector<128x16xbf16>
    %c0_14 = arith.constant 0 : index
    %c0_15 = arith.constant 0 : index
    %25 = vector.load %arg6[%c0_14, %c0_15] : memref<1x16xbf16, #tpu.memory_space<vmem>>, vector<1x16xbf16>
    %cst_16 = arith.constant dense<0.000000e+00> : vector<1x128xf32>
    %26 = tpu.matmul %25, %24, %cst_16 {dimension_numbers = #tpu.dot_dimension_numbers<[1], [1], [0], [0], [0, 0, 1, 0], [], []>} : vector<1x16xbf16>, vector<128x16xbf16>, vector<1x128xf32> -> vector<1x128xf32>
    %c0_17 = arith.constant 0 : index
    %c0_18 = arith.constant 0 : index
    %27 = vector.load %arg7[%c0_17, %c0_18] : memref<1x16xbf16, #tpu.memory_space<vmem>>, vector<1x16xbf16>
    %cst_19 = arith.constant dense<0.000000e+00> : vector<1x128xf32>
    %28 = tpu.matmul %27, %24, %cst_19 {dimension_numbers = #tpu.dot_dimension_numbers<[1], [1], [0], [0], [0, 0, 1, 0], [], []>} : vector<1x16xbf16>, vector<128x16xbf16>, vector<1x128xf32> -> vector<1x128xf32>
    %29 = arith.truncf %26 : vector<1x128xf32> to vector<1x128xbf16>
    %c0_20 = arith.constant 0 : index
    %c0_21 = arith.constant 0 : index
    %30 = vector.load %arg1[%c0_20, %c0_21] : memref<128x128xbf16, #tpu.memory_space<vmem>>, vector<128x128xbf16>
    %cst_22 = arith.constant dense<0.000000e+00> : vector<1x128xf32>
    %31 = tpu.matmul %29, %30, %cst_22 {dimension_numbers = #tpu.dot_dimension_numbers<[1], [0], [0], [1], [0, 0, 1, 1], [], []>} : vector<1x128xbf16>, vector<128x128xbf16>, vector<1x128xf32> -> vector<1x128xf32>
    %32 = arith.addf %31, %28 : vector<1x128xf32>
    %c0_23 = arith.constant 0 : index
    %c0_24 = arith.constant 0 : index
    %33 = vector.load %arg8[%c0_23, %c0_24] : memref<1x1xf32, #tpu.memory_space<vmem>>, vector<1x1xf32>
    %34 = vector.broadcast %33 : vector<1x1xf32> to vector<1x128xf32>
    %35 = arith.addf %32, %34 : vector<1x128xf32>
    %36 = math.tanh %35 : vector<1x128xf32>
    %c0_25 = arith.constant 0 : index
    %c0_26 = arith.constant 0 : index
    %37 = vector.load %arg10[%c0_25, %c0_26] : memref<1x128xf32, #tpu.memory_space<vmem>>, vector<1x128xf32>
    tpu.vector_store %arg10[%c0_25, %c0_26], %36 {strides = array<i32>} : memref<1x128xf32, #tpu.memory_space<vmem>>, vector<1x128xf32>,
    return
  }
}

module attributes {stable_mosaic.version = 11 : i64} {
  func.func @_gcn_kernel(%arg0: memref<128x128xbf16, #tpu.memory_space<vmem>>, %arg1: memref<128x1xf32, #tpu.memory_space<vmem>>, %arg2: memref<128x32xf32, #tpu.memory_space<vmem>>, %arg3: memref<32x16xbf16, #tpu.memory_space<vmem>>, %arg4: memref<1x16xf32, #tpu.memory_space<vmem>>, %arg5: memref<128x16xf32, #tpu.memory_space<vmem>>) attributes {dimension_semantics = [], scalar_prefetch = 0 : i64, scratch_operands = 0 : i64, tpu.core_type = #tpu.core_type<tc>} {
    %c0 = arith.constant 0 : index
    %c0_0 = arith.constant 0 : index
    %0 = vector.load %arg1[%c0, %c0_0] : memref<128x1xf32, #tpu.memory_space<vmem>>, vector<128x1xf32>
    %c0_1 = arith.constant 0 : index
    %c0_2 = arith.constant 0 : index
    %1 = vector.load %arg2[%c0_1, %c0_2] : memref<128x32xf32, #tpu.memory_space<vmem>>, vector<128x32xf32>
    %2 = arith.truncf %1 : vector<128x32xf32> to vector<128x32xbf16>
    %c0_3 = arith.constant 0 : index
    %c0_4 = arith.constant 0 : index
    %3 = vector.load %arg3[%c0_3, %c0_4] : memref<32x16xbf16, #tpu.memory_space<vmem>>, vector<32x16xbf16>
    %cst = arith.constant dense<0.000000e+00> : vector<128x16xf32>
    %4 = tpu.matmul %2, %3, %cst {dimension_numbers = #tpu.dot_dimension_numbers<[1], [0], [0], [1], [0, 0, 1, 1], [], []>} : vector<128x32xbf16>, vector<32x16xbf16>, vector<128x16xf32> -> vector<128x16xf32>
    %c0_5 = arith.constant 0 : index
    %c0_6 = arith.constant 0 : index
    %5 = vector.load %arg0[%c0_5, %c0_6] : memref<128x128xbf16, #tpu.memory_space<vmem>>, vector<128x128xbf16>
    %6 = vector.broadcast %0 : vector<128x1xf32> to vector<128x16xf32>
    %7 = arith.mulf %6, %4 : vector<128x16xf32>
    %8 = arith.truncf %7 : vector<128x16xf32> to vector<128x16xbf16>
    %cst_7 = arith.constant dense<0.000000e+00> : vector<128x16xf32>
    %9 = tpu.matmul %5, %8, %cst_7 {dimension_numbers = #tpu.dot_dimension_numbers<[1], [0], [0], [1], [0, 0, 1, 1], [], []>} : vector<128x128xbf16>, vector<128x16xbf16>, vector<128x16xf32> -> vector<128x16xf32>
    %cst_8 = arith.constant 0.000000e+00 : f32
    %10 = vector.broadcast %cst_8 : f32 to vector<128x1xf32>
    %11 = arith.cmpf ogt, %0, %10 : vector<128x1xf32>
    %12 = arith.extui %11 : vector<128x1xi1> to vector<128x1xi32>
    %13 = arith.sitofp %12 : vector<128x1xi32> to vector<128x1xf32>
    %14 = vector.broadcast %0 : vector<128x1xf32> to vector<128x16xf32>
    %15 = arith.mulf %14, %9 : vector<128x16xf32>
    %c0_9 = arith.constant 0 : index
    %c0_10 = arith.constant 0 : index
    %16 = vector.load %arg4[%c0_9, %c0_10] : memref<1x16xf32, #tpu.memory_space<vmem>>, vector<1x16xf32>
    %17 = vector.broadcast %16 : vector<1x16xf32> to vector<128x16xf32>
    %18 = arith.addf %15, %17 : vector<128x16xf32>
    %cst_11 = arith.constant 0.000000e+00 : f32
    %19 = vector.broadcast %cst_11 : f32 to vector<128x16xf32>
    %20 = arith.maximumf %18, %19 : vector<128x16xf32>
    %21 = vector.broadcast %13 : vector<128x1xf32> to vector<128x16xf32>
    %22 = arith.mulf %20, %21 : vector<128x16xf32>
    %c0_12 = arith.constant 0 : index
    %c0_13 = arith.constant 0 : index
    %23 = vector.load %arg5[%c0_12, %c0_13] : memref<128x16xf32, #tpu.memory_space<vmem>>, vector<128x16xf32>
    tpu.vector_store %arg5[%c0_12, %c0_13], %22 {strides = array<i32>} : memref<128x16xf32, #tpu.memory_space<vmem>>, vector<128x16xf32>,
    return
  }
}

</mosaic_0001>

<bundles_post_ra>
// kernel: graph_unet_forward.5
= control target key start
LH: loop header
LB: loop body
LE: loop exit
PB: predicated region body
PF: predicated region fallthrough
CT: control target
= control target key end

     0   :  { %v1203_v1 = vmov 0   ;;  %vm85_vm0 = vcmask 130048   ;;  %v1204_v12 = vmov 0.0   ;;  %s1678_s4 = inlined_call_operand.vmem [shape: bf16[16,16], index: 4, kind: input, shape index: {}]   ;;  %s1679_s3 = inlined_call_operand.vmem [shape: f32[128,16], index: 3, kind: input, shape index: {}]   ;;  %s1680_s8 = inlined_call_operand.<no memory space> [shape: f32[1,1], index: 8, kind: input, shape index: {}]   ;;  %s1681_s2 = inlined_call_operand.vmem [shape: f32[128,1], index: 2, kind: input, shape index: {}]   ;;  %s1682_s0 = inlined_call_operand.vmem [shape: bf16[128,128], index: 0, kind: input, shape index: {}]   ;;  %s1683_s1 = inlined_call_operand.vmem [shape: bf16[128,128], index: 1, kind: input, shape index: {}]   ;;  %s1684_s5 = inlined_call_operand.vmem [shape: f32[1,16], index: 5, kind: input, shape index: {}]   ;;  %s1685_s9 = inlined_call_operand.vmem [shape: f32[128,16], index: 9, kind: output, shape index: {0}]   ;;  %s1686_s6 = inlined_call_operand.vmem [shape: bf16[1,16], index: 6, kind: input, shape index: {}]   ;;  %s1687_s7 = inlined_call_operand.vmem [shape: bf16[1,16], index: 7, kind: input, shape index: {}]   ;;  %s1688_s10 = inlined_call_operand.vmem [shape: f32[1,128], index: 10, kind: output, shape index: {1}]  }
   0x1   :  { %v1184_v0 = vld [vmem:[%s1678_s4] sm:$0xff]   ;;  %1142 = vset.pattern.permute.xlu0 %v1203_v1  ;;  %1143 = vset.pattern.permute.xlu1 %v1203_v1  ;;  %v16_v2 = vstv %s1680_s8  ;;  %v54_v4 = vld [vmem:[%s1679_s3 + $0x8] sm:$0xff]  ;;  %v55_v5 = vld [vmem:[%s1679_s3 + $0x10] sm:$0xff] }
   0x2   :  { %v53_v3 = vld [vmem:[%s1679_s3] sm:$0xff]  ;;  %17 = vst [vmem:[#allocation2] sm:$0x1] %v16_v2  ;;  %1029 = vmatprep.subr.bf16.mxu0 %v1184_v0  ;;  %v56_v7 = vld [vmem:[%s1679_s3 + $0x18] sm:$0xff]  ;;  %v58_v9 = vld [vmem:[%s1679_s3 + $0x28] sm:$0xff] }
   0x3   :  { %v69_v6 = vpack.c.bf16 %v54_v4, %v53_v3  ;;  %v57_v8 = vld [vmem:[%s1679_s3 + $0x20] sm:$0xff]  ;;  %1030 = vmatpush3.bf16.msra.mxu0 %v1184_v0  ;;  %v70_v10 = vpack.c.bf16 %v56_v7, %v55_v5  ;;  %v51_v13 = vld [vmem:[%s1681_s2 + $0x70] sm:$0xff]  ;;  %v60_v15 = vld [vmem:[%s1679_s3 + $0x38] sm:$0xff] }
   0x4   :  { %v71_v11 = vpack.c.bf16 %v58_v9, %v57_v8  ;;  %1079 = vmatprep.subr.bf16.mxu0 %v1204_v12  ;;  %v59_v14 = vld [vmem:[%s1679_s3 + $0x30] sm:$0xff]  ;;  %295 = vperm.xlu0 %1142, %v51_v13   ;;  %v49_v16 = vld [vmem:[%s1681_s2 + $0x60] sm:$0xff]  ;;  %v62_v18 = vld [vmem:[%s1679_s3 + $0x48] sm:$0xff]  ;;  %vm486_vm1 = vcmp.gt.f32.partialorder %v51_v13, 0.0 }
   0x5   :  { %1031 = vmatprep.mubr.msk.bf16.mxu0 %vm85_vm0, %v69_v6  ;;  %v61_v17 = vld [vmem:[%s1679_s3 + $0x40] sm:$0xff]  ;;  %v52_v19 = vld [vmem:[%s1681_s2 + $0x78] sm:$0xff]  ;;  %285 = vperm.xlu1 %1143, %v49_v16   ;;  %v50_v20 = vld [vmem:[%s1681_s2 + $0x68] sm:$0xff]  ;;  %v72_v21 = vpack.c.bf16 %v60_v15, %v59_v14  ;;  %vm484_vm3 = vcmp.gt.f32.partialorder %v49_v16, 0.0  ;;  %v964_v42 = vsel %vm486_vm1, 1.0, %v1204_v12 }
   0x6   :  { %1032 = vmatmul.mubr.msk.bf16.vlgmr.msra.gmra.mxu0 %vm85_vm0, %v70_v10  ;;  %v73_v22 = vpack.c.bf16 %v62_v18, %v61_v17  ;;  %v47_v23 = vld [vmem:[%s1681_s2 + $0x50] sm:$0xff]  ;;  %v48_v24 = vld [vmem:[%s1681_s2 + $0x58] sm:$0xff]  ;;  %v65_v27 = vld [vmem:[%s1679_s3 + $0x60] sm:$0xff]  ;;  %vm487_vm2 = vcmp.gt.f32.partialorder %v52_v19, 0.0  ;;  %vm485_vm4 = vcmp.gt.f32.partialorder %v50_v20, 0.0  ;;  %v962_v45 = vsel %vm484_vm3, 1.0, %v1204_v12 }
   0x7   :  { %1035 = vmatprep.mubr.msk.bf16.mxu0 %vm85_vm0, %v71_v11  ;;  %v63_v25 = vld [vmem:[%s1679_s3 + $0x50] sm:$0xff]  ;;  %v64_v26 = vld [vmem:[%s1679_s3 + $0x58] sm:$0xff]  ;;  %v66_v28 = vld [vmem:[%s1679_s3 + $0x68] sm:$0xff]  ;;  %v965_v43 = vsel %vm487_vm2, 1.0, %v1204_v12  ;;  %v963_v46 = vsel %vm485_vm4, 1.0, %v1204_v12  ;;  %vm482_vm5 = vcmp.gt.f32.partialorder %v47_v23, 0.0 }
   0x8   :  { %300 = vperm.xlu0 %1142, %v52_v19   ;;  %v45_v29 = vld [vmem:[%s1681_s2 + $0x40] sm:$0xff]  ;;  %v46_v30 = vld [vmem:[%s1681_s2 + $0x48] sm:$0xff]  ;;  %v74_v31 = vpack.c.bf16 %v64_v26, %v63_v25  ;;  %v75_v32 = vpack.c.bf16 %v66_v28, %v65_v27  ;;  %v43_v33 = vld [vmem:[%s1681_s2 + $0x30] sm:$0xff]  ;;  %vm483_vm6 = vcmp.gt.f32.partialorder %v48_v24, 0.0  ;;  %v1144_v48 = vpack.i.bf16 %v965_v43, %v964_v42 }
   0x9   :  { %290 = vperm.xlu1 %1143, %v50_v20   ;;  %v44_v34 = vld [vmem:[%s1681_s2 + $0x38] sm:$0xff]  ;;  %v67_v35 = vld [vmem:[%s1679_s3 + $0x70] sm:$0xff]  ;;  %v41_v37 = vld [vmem:[%s1681_s2 + $0x20] sm:$0xff]  ;;  %vm480_vm7 = vcmp.gt.f32.partialorder %v45_v29, 0.0  ;;  %vm481_vm8 = vcmp.gt.f32.partialorder %v46_v30, 0.0  ;;  %v960_v49 = vsel %vm482_vm5, 1.0, %v1204_v12  ;;  %v1149_v51 = vpack.i.bf16 %v963_v46, %v962_v45 }
   0xa   :  { %v68_v36 = vld [vmem:[%s1679_s3 + $0x78] sm:$0xff]  ;;  %v42_v38 = vld [vmem:[%s1681_s2 + $0x28] sm:$0xff]  ;;  %v39_v40 = vld [vmem:[%s1681_s2 + $0x10] sm:$0xff]  ;;  %v961_v50 = vsel %vm483_vm6, 1.0, %v1204_v12  ;;  %v958_v52 = vsel %vm480_vm7, 1.0, %v1204_v12  ;;  %v959_v53 = vsel %vm481_vm8, 1.0, %v1204_v12 }
   0xb   :  { %v76_v39 = vpack.c.bf16 %v68_v36, %v67_v35  ;;  %v40_v41 = vld [vmem:[%s1681_s2 + $0x18] sm:$0xff]  ;;  %v37_v44 = vld [vmem:[%s1681_s2] sm:$0xff]  ;;  %v38_v47 = vld [vmem:[%s1681_s2 + $0x8] sm:$0xff]  ;;  %vm478_vm9 = vcmp.gt.f32.partialorder %v43_v33, 0.0  ;;  %vm479_vm10 = vcmp.gt.f32.partialorder %v44_v34, 0.0  ;;  %vm476_vm11 = vcmp.gt.f32.partialorder %v41_v37, 0.0 }
   0xc   :  { %275 = vperm.xlu0 %1142, %v47_v23   ;;  %vm477_vm12 = vcmp.gt.f32.partialorder %v42_v38, 0.0  ;;  %v1154_v54 = vpack.i.bf16 %v961_v50, %v960_v49  ;;  %v956_v55 = vsel %vm478_vm9, 1.0, %v1204_v12  ;;  %v957_v56 = vsel %vm479_vm10, 1.0, %v1204_v12  ;;  %v912_v4 = vld [vmem:[#allocation2] sm:$0x1] }
   0xd   :  { %280 = vperm.xlu1 %1143, %v48_v24   ;;  %v1159_v57 = vpack.i.bf16 %v959_v53, %v958_v52  ;;  %v954_v58 = vsel %vm476_vm11, 1.0, %v1204_v12  ;;  %v955_v59 = vsel %vm477_vm12, 1.0, %v1204_v12  ;;  %vm474_vm13 = vcmp.gt.f32.partialorder %v39_v40, 0.0  ;;  %v1185_v5 = vld [vmem:[%s1682_s0] sm:$0xff]  }
   0xe   :  { %1036 = vmatmul.mubr.msk.bf16.gmra.mxu0 %vm85_vm0, %v72_v21  ;;  %vm475_vm14 = vcmp.gt.f32.partialorder %v40_v41, 0.0  ;;  %vm472_vm15 = vcmp.gt.f32.partialorder %v37_v44, 0.0  ;;  %vm473_vm1 = vcmp.gt.f32.partialorder %v38_v47, 0.0  ;;  %v1164_v60 = vpack.i.bf16 %v957_v56, %v956_v55  ;;  %1063 = vmatprep.mubr.bf16.mxu1 %v1185_v5  ;;  %v1192_v5 = vld [vmem:[%s1682_s0 + $0x38] sm:$0xff]  }
   0xf   :  { %1039 = vmatprep.mubr.msk.bf16.mxu0 %vm85_vm0, %v73_v22  ;;  %v952_v61 = vsel %vm474_vm13, 1.0, %v1204_v12  ;;  %v953_v62 = vsel %vm475_vm14, 1.0, %v1204_v12  ;;  %v1169_v63 = vpack.i.bf16 %v955_v59, %v954_v58  ;;  %v950_v0 = vsel %vm472_vm15, 1.0, %v1204_v12 }
  0x10   :  { %265 = vperm.xlu0 %1142, %v45_v29   ;;  %v951_v1 = vsel %vm473_vm1, 1.0, %v1204_v12  ;;  %v1174_v2 = vpack.i.bf16 %v953_v62, %v952_v61  ;;  %vm1205_vm2 = vmmov 0  }
  0x11   :  { %270 = vperm.xlu1 %1143, %v46_v30   ;;  %v1179_v3 = vpack.i.bf16 %v951_v1, %v950_v0  ;;  %v1187_v0 = vld [vmem:[%s1682_s0 + $0x10] sm:$0xff]   ;;  %v1188_v1 = vld [vmem:[%s1682_s0 + $0x18] sm:$0xff]  }
  0x14   :  { %255 = vperm.xlu0 %1142, %v43_v33  }
  0x15   :  { %260 = vperm.xlu1 %1143, %v44_v34  }
  0x16   :  { %1040 = vmatmul.mubr.msk.bf16.gmra.mxu0 %vm85_vm0, %v74_v31 }
  0x17   :  { %1043 = vmatprep.mubr.msk.bf16.mxu0 %vm85_vm0, %v75_v32 }
  0x18   :  { %245 = vperm.xlu0 %1142, %v41_v37  }
  0x19   :  { %250 = vperm.xlu1 %1143, %v42_v38  }
  0x1c   :  { %235 = vperm.xlu0 %1142, %v39_v40  }
  0x1d   :  { %240 = vperm.xlu1 %1143, %v40_v41  }
  0x1e   :  { %1044 = vmatmul.mubr.msk.bf16.gmra.mxu0 %vm85_vm0, %v76_v39 }
  0x1f   :  { %1095 = vmatprep.mubr.msk.bf16.mxu0 %vm1205_vm2, %v1204_v12 }
  0x20   :  { %225 = vperm.xlu0 %1142, %v37_v44  }
  0x21   :  { %230 = vperm.xlu1 %1143, %v38_v47  }
  0x24   :  { %1145 = vperm.xlu0 %1142, %v1144_v48  }
  0x25   :  { %1150 = vperm.xlu1 %1143, %v1149_v51  }
  0x28   :  { %1155 = vperm.xlu0 %1142, %v1154_v54  }
  0x29   :  { %1160 = vperm.xlu1 %1143, %v1159_v57  }
  0x2c   :  { %1165 = vperm.xlu0 %1142, %v1164_v60  }
  0x2d   :  { %1170 = vperm.xlu1 %1143, %v1169_v63   ;;  %v1186_v63 = vld [vmem:[%s1682_s0 + $0x8] sm:$0xff]  }
  0x30   :  { %1175 = vperm.xlu0 %1142, %v1174_v2   ;;  %v1189_v2 = vld [vmem:[%s1682_s0 + $0x20] sm:$0xff]  }
  0x31   :  { %1180 = vperm.xlu1 %1143, %v1179_v3   ;;  %v1190_v3 = vld [vmem:[%s1682_s0 + $0x28] sm:$0xff]  }
  0x34   :  { %915 = vperm.xlu0 %1142, %v912_v4   ;;  %v1191_v4 = vld [vmem:[%s1682_s0 + $0x30] sm:$0xff]  }
  0x7f   :  { %v1395_v13 = vpop.permute.xlu0 %295 }
  0x80   :  { %v1393_v10 = vpop.permute.xlu1 %285 }
  0x83   :  { %v1399_v18 = vpop.permute.xlu0 %300 }
  0x84   :  { %v1397_v16 = vpop.permute.xlu1 %290 }
  0x87   :  { %v1403_v23 = vpop.permute.xlu0 %275 }
  0x88   :  { %v1401_v21 = vpop.permute.xlu1 %280 }
  0x8b   :  { %v1407_v28 = vpop.permute.xlu0 %265 }
  0x8c   :  { %v1405_v26 = vpop.permute.xlu1 %270 }
  0x8f   :  { %v1416_v39 = vpop.permute.xlu0 %255 }
  0x90   :  { %v1413_v36 = vpop.permute.xlu1 %260 }
  0x93   :  { %v1423_v45 = vpop.permute.xlu0 %245 }
  0x94   :  { %v1420_v43 = vpop.permute.xlu1 %250 }
  0x97   :  { %v236_v52 = vpop.permute.xlu0 %235 }
  0x98   :  { %v241_v49 = vpop.permute.xlu1 %240 }
  0x9b   :  { %v226_v58 = vpop.permute.xlu0 %225 }
  0x9c   :  { %v231_v56 = vpop.permute.xlu1 %230 }
  0xc6   :  { %v1033_v6 = vpop.f32.mrf.mxu0 }
  0xc7   :  { %v305_v57 = vmul.f32 %v1033_v6, %v236_v52  ;;  %v1456_v6 = vpop.permute.xlu1 %1150 }
  0xc8   :  { %v1391_v7 = vpop.f32.mrf.mxu0 }
  0xc9   :  { %v303_v61 = vmul.f32 %v226_v58, %v1391_v7  ;;  %v1458_v7 = vpop.permute.xlu0 %1145 }
  0xca   :  { %v1034_v8 = vpop.f32.mrf.mxu0 }
  0xcb   :  { %v306_v54 = vmul.f32 %v1034_v8, %v241_v49  ;;  %v1460_v8 = vpop.permute.xlu1 %1160 }
  0xcc   :  { %v147_v9 = vpop.f32.mrf.mxu0 }
  0xcd   :  { %v320_v59 = vpack.c.bf16 %v306_v54, %v305_v57  ;;  %v304_v60 = vmul.f32 %v231_v56, %v147_v9  ;;  %v1462_v9 = vpop.permute.xlu0 %1155 }
  0xce   :  { %v1037_v11 = vpop.f32.mrf.mxu0 }
  0xcf   :  { %v309_v48 = vmul.f32 %v1037_v11, %v1416_v39  ;;  %v319_v62 = vpack.c.bf16 %v304_v60, %v303_v61  ;;  %v1464_v11 = vpop.permute.xlu1 %1170 }
  0xd0   :  { %v160_v14 = vpop.f32.mrf.mxu0  ;;  %v1172_v61 = vunpack.i.l.bf16 %v1464_v11 }
  0xd1   :  { %v307_v53 = vmul.f32 %v1423_v45, %v160_v14  ;;  %v1166_v14 = vpop.permute.xlu0 %1165 }
  0xd2   :  { %v1038_v15 = vpop.f32.mrf.mxu0 }
  0xd3   :  { %v310_v46 = vmul.f32 %v1038_v15, %v1413_v36 }
  0xd4   :  { %v163_v17 = vpop.f32.mrf.mxu0 }
  0xd5   :  { %v322_v50 = vpack.c.bf16 %v310_v46, %v309_v48  ;;  %v308_v51 = vmul.f32 %v1420_v43, %v163_v17  ;;  %v1469_v17 = vld [vmem:[%s1684_s5] ss:$0 sm:$0xff] }
  0xd6   :  { %v1041_v19 = vpop.f32.mrf.mxu0 }
  0xd7   :  { %v313_v40 = vmul.f32 %v1041_v19, %v1403_v23  ;;  %v321_v55 = vpack.c.bf16 %v308_v51, %v307_v53 }
  0xd8   :  { %v176_v20 = vpop.f32.mrf.mxu0 }
  0xd9   :  { %v311_v44 = vmul.f32 %v1407_v28, %v176_v20 }
  0xda   :  { %v1042_v22 = vpop.f32.mrf.mxu0 }
  0xdb   :  { %v314_v37 = vmul.f32 %v1042_v22, %v1401_v21  ;;  %v1181_v22 = vpop.permute.xlu1 %1180 }
  0xdc   :  { %v179_v24 = vpop.f32.mrf.mxu0 }
  0xdd   :  { %v324_v41 = vpack.c.bf16 %v314_v37, %v313_v40  ;;  %v312_v42 = vmul.f32 %v1405_v26, %v179_v24 }
  0xde   :  { %v1045_v25 = vpop.f32.mrf.mxu0 }
  0xdf   :  { %v317_v30 = vmul.f32 %v1045_v25, %v1395_v13  ;;  %v323_v47 = vpack.c.bf16 %v312_v42, %v311_v44 }
  0xe0   :  { %v192_v27 = vpop.f32.mrf.mxu0 }
  0xe1   :  { %v315_v33 = vmul.f32 %v1393_v10, %v192_v27  ;;  %v1176_v27 = vpop.permute.xlu0 %1175 }
  0xe2   :  { %v1046_v29 = vpop.f32.mrf.mxu0  ;;  %v1178_v42 = vunpack.i.h.bf16 %v1176_v27 }
  0xe3   :  { %v318_v31 = vmul.f32 %v1046_v29, %v1399_v18 }
  0xe4   :  { %v195_v32 = vpop.f32.mrf.mxu0 }
  0xe5   :  { %v316_v34 = vmul.f32 %v1397_v16, %v195_v32  ;;  %v326_v35 = vpack.c.bf16 %v318_v31, %v317_v30  ;;  %v1177_v30 = vunpack.i.l.bf16 %v1176_v27 }
  0xe7   :  { %v325_v38 = vpack.c.bf16 %v316_v34, %v315_v33  ;;  %1047 = vmatprep.subr.bf16.mxu1 %v326_v35  ;;  %v1182_v34 = vunpack.i.l.bf16 %v1181_v22 }
  0xe8   :  { %1048 = vmatpush3.bf16.msra.mxu1 %v326_v35 }
  0xe9   :  { %1049 = vmatprep.subr.bf16.mxu1 %v325_v38 }
  0xec   :  { %1050 = vmatpush3.bf16.msra.mxu1 %v325_v38 }
  0xed   :  { %1051 = vmatprep.subr.bf16.mxu1 %v324_v41 }
  0xf0   :  { %1052 = vmatpush3.bf16.msra.mxu1 %v324_v41 }
  0xf1   :  { %1053 = vmatprep.subr.bf16.mxu1 %v323_v47 }
  0xf4   :  { %1054 = vmatpush3.bf16.msra.mxu1 %v323_v47 }
  0xf5   :  { %1055 = vmatprep.subr.bf16.mxu1 %v322_v50 }
  0xf8   :  { %1056 = vmatpush3.bf16.msra.mxu1 %v322_v50  ;;  %v1183_v50 = vunpack.i.h.bf16 %v1181_v22 }
  0xf9   :  { %1057 = vmatprep.subr.bf16.mxu1 %v321_v55 }
  0xfc   :  { %1058 = vmatpush3.bf16.msra.mxu1 %v321_v55 }
  0xfd   :  { %1059 = vmatprep.subr.bf16.mxu1 %v320_v59 }
 0x100   :  { %1060 = vmatpush3.bf16.msra.mxu1 %v320_v59 }
 0x101   :  { %1061 = vmatprep.subr.bf16.mxu1 %v319_v62 }
 0x104   :  { %1062 = vmatpush3.bf16.msra.mxu1 %v319_v62 }
 0x105   :  { %1099 = vmatprep.subr.bf16.mxu1 %v1204_v12 }
 0x107   :  { %1064 = vmatmul.mubr.bf16.vlgmr.msra.gmra.mxu1 %v1186_v63 }
 0x108   :  { %1067 = vmatprep.mubr.bf16.mxu1 %v1187_v0 }
 0x10f   :  { %1068 = vmatmul.mubr.bf16.gmra.mxu1 %v1188_v1 }
 0x110   :  { %1071 = vmatprep.mubr.bf16.mxu1 %v1189_v2 }
 0x117   :  { %1072 = vmatmul.mubr.bf16.gmra.mxu1 %v1190_v3 }
 0x118   :  { %1075 = vmatprep.mubr.bf16.mxu1 %v1191_v4 }
 0x11f   :  { %1076 = vmatmul.mubr.bf16.gmra.mxu1 %v1192_v5 }
 0x120   :  { %1115 = vmatprep.mubr.msk.bf16.mxu1 %vm1205_vm2, %v1204_v12 }
 0x1c7   :  { %v1065_v15 = vpop.f32.mrf.mxu1 }
 0x1c8   :  { %v522_v19 = vmul.f32 %v1065_v15, %v236_v52 }
 0x1c9   :  { %v409_v20 = vpop.f32.mrf.mxu1 }
 0x1ca   :  { %v545_v24 = vadd.f32 %v1469_v17, %v522_v19  ;;  %v520_v25 = vmul.f32 %v409_v20, %v226_v58 }
 0x1cb   :  { %v1066_v29 = vpop.f32.mrf.mxu1 }
 0x1cc   :  { %v561_v31 = vmax.f32 %v545_v24, 0.0  ;;  %v543_v32 = vadd.f32 %v1469_v17, %v520_v25  ;;  %v523_v33 = vmul.f32 %v1066_v29, %v241_v49  ;;  %v1157_v29 = vunpack.i.l.bf16 %v1462_v9 }
 0x1cd   :  { %v412_v35 = vpop.f32.mrf.mxu1 }
 0x1ce   :  { %v1473_v37 = vmul.f32 %v1177_v30, %v561_v31  ;;  %v559_v38 = vmax.f32 %v543_v32, 0.0  ;;  %v546_v40 = vadd.f32 %v1469_v17, %v523_v33  ;;  %v521_v41 = vmul.f32 %v412_v35, %v231_v56 }
 0x1cf   :  { %v1069_v44 = vpop.f32.mrf.mxu1  ;;  %v1167_v56 = vunpack.i.l.bf16 %v1166_v14  ;;  %v1162_v33 = vunpack.i.l.bf16 %v1460_v8 }
 0x1d0   :  { %673 = vst.msk [vmem:[%s1685_s9 + $0x10] sm:$0xff] %vm85_vm0, %v1473_v37  ;;  %v1481_v46 = vmul.f32 %v1182_v34, %v559_v38  ;;  %v562_v47 = vmax.f32 %v546_v40, 0.0  ;;  %v544_v48 = vadd.f32 %v1469_v17, %v521_v41  ;;  %v526_v49 = vmul.f32 %v1069_v44, %v1416_v39 }
 0x1d1   :  { %v425_v51 = vpop.f32.mrf.mxu1  ;;  %v1158_v41 = vunpack.i.h.bf16 %v1462_v9 }
 0x1d2   :  { %671 = vst.msk [vmem:[%s1685_s9] sm:$0xff] %vm85_vm0, %v1481_v46  ;;  %v1490_v52 = vmul.f32 %v1178_v42, %v562_v47  ;;  %v560_v53 = vmax.f32 %v544_v48, 0.0  ;;  %v549_v54 = vadd.f32 %v1469_v17, %v526_v49  ;;  %v524_v55 = vmul.f32 %v425_v51, %v1423_v45 }
 0x1d3   :  { %v1070_v57 = vpop.f32.mrf.mxu1  ;;  %v1163_v49 = vunpack.i.h.bf16 %v1460_v8 }
 0x1d4   :  { %674 = vst.msk [vmem:[%s1685_s9 + $0x18] sm:$0xff] %vm85_vm0, %v1490_v52  ;;  %v1499_v39 = vmul.f32 %v1183_v50, %v560_v53  ;;  %v565_v58 = vmax.f32 %v549_v54, 0.0  ;;  %v547_v59 = vadd.f32 %v1469_v17, %v524_v55  ;;  %v527_v60 = vmul.f32 %v1070_v57, %v1413_v36 }
 0x1d5   :  { %v428_v62 = vpop.f32.mrf.mxu1  ;;  %v688_v45 = vpack.c.bf16 %v1490_v52, %v1473_v37  ;;  %v1168_v36 = vunpack.i.h.bf16 %v1166_v14  ;;  %v1147_v54 = vunpack.i.l.bf16 %v1458_v7  ;;  %v695_v37 = vld [vmem:[%s1686_s6] sm:$0x1]  ;;  %v1193_v52 = vld [vmem:[%s1683_s1 + $0x38] sm:$0xff]  }
 0x1d6   :  { %672 = vst.msk [vmem:[%s1685_s9 + $0x8] sm:$0xff] %vm85_vm0, %v1499_v39  ;;  %v1511_v63 = vmul.f32 %v1167_v56, %v565_v58  ;;  %v563_v0 = vmax.f32 %v547_v59, 0.0  ;;  %v550_v1 = vadd.f32 %v1469_v17, %v527_v60  ;;  %v525_v2 = vmul.f32 %v428_v62, %v1420_v43 }
 0x1d7   :  { %v1073_v3 = vpop.f32.mrf.mxu1  ;;  %v687_v4 = vpack.c.bf16 %v1499_v39, %v1481_v46  ;;  %v1173_v43 = vunpack.i.h.bf16 %v1464_v11  ;;  %v1152_v58 = vunpack.i.l.bf16 %v1456_v6  ;;  %v1194_v46 = vld [vmem:[%s1683_s1 + $0x30] sm:$0xff]   ;;  %v1195_v39 = vld [vmem:[%s1683_s1 + $0x28] sm:$0xff]  }
 0x1d8   :  { %677 = vst.msk [vmem:[%s1685_s9 + $0x30] sm:$0xff] %vm85_vm0, %v1511_v63  ;;  %v1522_v5 = vmul.f32 %v1172_v61, %v563_v0  ;;  %v566_v15 = vmax.f32 %v550_v1, 0.0  ;;  %v548_v19 = vadd.f32 %v1469_v17, %v525_v2  ;;  %v530_v20 = vmul.f32 %v1073_v3, %v1403_v23 }
 0x1d9   :  { %v441_v14 = vpop.f32.mrf.mxu1  ;;  %v1148_v0 = vunpack.i.h.bf16 %v1458_v7 }
 0x1da   :  { %675 = vst.msk [vmem:[%s1685_s9 + $0x20] sm:$0xff] %vm85_vm0, %v1522_v5  ;;  %v1532_v22 = vmul.f32 %v1168_v36, %v566_v15  ;;  %v564_v24 = vmax.f32 %v548_v19, 0.0  ;;  %v553_v25 = vadd.f32 %v1469_v17, %v530_v20  ;;  %v528_v27 = vmul.f32 %v441_v14, %v1407_v28 }
 0x1db   :  { %v1074_v30 = vpop.f32.mrf.mxu1  ;;  %v1153_v36 = vunpack.i.h.bf16 %v1456_v6 }
 0x1dc   :  { %678 = vst.msk [vmem:[%s1685_s9 + $0x38] sm:$0xff] %vm85_vm0, %v1532_v22  ;;  %v1542_v23 = vmul.f32 %v1173_v43, %v564_v24  ;;  %v569_v11 = vmax.f32 %v553_v25, 0.0  ;;  %v551_v31 = vadd.f32 %v1469_v17, %v528_v27  ;;  %v531_v32 = vmul.f32 %v1074_v30, %v1401_v21 }
 0x1dd   :  { %v444_v34 = vpop.f32.mrf.mxu1  ;;  %v690_v25 = vpack.c.bf16 %v1532_v22, %v1511_v63  ;;  %v703_v63 = vsel %vm85_vm0, %v688_v45, 0  ;;  %v763_v45 = vld [vmem:[%s1687_s7] sm:$0x1]  ;;  %v1197_v22 = vld [vmem:[%s1683_s1 + $0x18] sm:$0xff]  }
 0x1de   :  { %676 = vst.msk [vmem:[%s1685_s9 + $0x28] sm:$0xff] %vm85_vm0, %v1542_v23  ;;  %v665_v28 = vmul.f32 %v1157_v29, %v569_v11  ;;  %v567_v35 = vmax.f32 %v551_v31, 0.0  ;;  %v554_v38 = vadd.f32 %v1469_v17, %v531_v32  ;;  %v529_v40 = vmul.f32 %v444_v34, %v1405_v26  ;;  %v1199_v11 = vld [vmem:[%s1683_s1 + $0x8] sm:$0xff]   ;;  %v1200_v31 = vld [vmem:[%s1683_s1] sm:$0xff]  }
 0x1df   :  { %v1077_v42 = vpop.f32.mrf.mxu1  ;;  %v709_v27 = vsel %vm85_vm0, %v690_v25, 0  ;;  %v689_v29 = vpack.c.bf16 %v1542_v23, %v1522_v5  ;;  %v700_v5 = vsel %vm85_vm0, %v687_v4, 0  ;;  %v1196_v4 = vld [vmem:[%s1683_s1 + $0x20] sm:$0xff]   ;;  %v1198_v23 = vld [vmem:[%s1683_s1 + $0x10] sm:$0xff]  }
 0x1e0   :  { %681 = vst.msk [vmem:[%s1685_s9 + $0x50] sm:$0xff] %vm85_vm0, %v665_v28  ;;  %v663_v21 = vmul.f32 %v1162_v33, %v567_v35  ;;  %v570_v44 = vmax.f32 %v554_v38, 0.0  ;;  %v552_v47 = vadd.f32 %v1469_v17, %v529_v40  ;;  %v534_v48 = vmul.f32 %v1077_v42, %v1395_v13 }
 0x1e1   :  { %v457_v50 = vpop.f32.mrf.mxu1  ;;  %v706_v30 = vsel %vm85_vm0, %v689_v29, 0 }
 0x1e2   :  { %679 = vst.msk [vmem:[%s1685_s9 + $0x40] sm:$0xff] %vm85_vm0, %v663_v21  ;;  %v666_v26 = vmul.f32 %v1158_v41, %v570_v44  ;;  %v568_v9 = vmax.f32 %v552_v47, 0.0  ;;  %v557_v51 = vadd.f32 %v1469_v17, %v534_v48  ;;  %v532_v53 = vmul.f32 %v457_v50, %v1393_v10  ;;  %v916_v48 = vpop.permute.xlu0 %915 }
 0x1e3   :  { %v1078_v55 = vpop.f32.mrf.mxu1 }
 0x1e4   :  { %682 = vst.msk [vmem:[%s1685_s9 + $0x58] sm:$0xff] %vm85_vm0, %v666_v26  ;;  %v664_v13 = vmul.f32 %v1163_v49, %v568_v9  ;;  %v573_v8 = vmax.f32 %v557_v51, 0.0  ;;  %v555_v56 = vadd.f32 %v1469_v17, %v532_v53  ;;  %v535_v57 = vmul.f32 %v1078_v55, %v1399_v18 }
 0x1e5   :  { %v460_v59 = vpop.f32.mrf.mxu1  ;;  %v692_v20 = vpack.c.bf16 %v666_v26, %v665_v28 }
 0x1e6   :  { %680 = vst.msk [vmem:[%s1685_s9 + $0x48] sm:$0xff] %vm85_vm0, %v664_v13  ;;  %v669_v10 = vmul.f32 %v1147_v54, %v573_v8  ;;  %v571_v60 = vmax.f32 %v555_v56, 0.0  ;;  %v558_v61 = vadd.f32 %v1469_v17, %v535_v57  ;;  %v533_v62 = vmul.f32 %v460_v59, %v1397_v16 }
 0x1e7   :  { %v715_v43 = vsel %vm85_vm0, %v692_v20, 0  ;;  %v691_v14 = vpack.c.bf16 %v664_v13, %v663_v21  ;;  %v918_v21 = vlaneseq }
 0x1e8   :  { %685 = vst.msk [vmem:[%s1685_s9 + $0x70] sm:$0xff] %vm85_vm0, %v669_v10  ;;  %v667_v18 = vmul.f32 %v1152_v58, %v571_v60  ;;  %v574_v1 = vmax.f32 %v558_v61, 0.0  ;;  %v556_v2 = vadd.f32 %v1469_v17, %v533_v62 }
 0x1e9   :  { %v712_v24 = vsel %vm85_vm0, %v691_v14, 0  ;;  %v919_v44 = vshrl.u32 %v918_v21, 7 }
 0x1ea   :  { %683 = vst.msk [vmem:[%s1685_s9 + $0x60] sm:$0xff] %vm85_vm0, %v667_v18  ;;  %v670_v3 = vmul.f32 %v1148_v0, %v574_v1  ;;  %v572_v16 = vmax.f32 %v556_v2, 0.0 }
 0x1eb   :  { %v920_v47 = vsub.s32 0, %v919_v44 }
 0x1ec   :  { %686 = vst.msk [vmem:[%s1685_s9 + $0x78] sm:$0xff] %vm85_vm0, %v670_v3  ;;  %v668_v7 = vmul.f32 %v1153_v36, %v572_v16  ;;  %v694_v15 = vpack.c.bf16 %v670_v3, %v669_v10 }
 0x1ed   :  { %v921_v49 = vrot.slane %v916_v48, %v920_v47 }
 0x1ee   :  { %684 = vst.msk [vmem:[%s1685_s9 + $0x68] sm:$0xff] %vm85_vm0, %v668_v7  ;;  %v721_v6 = vsel %vm85_vm0, %v694_v15, 0  ;;  %v693_v17 = vpack.c.bf16 %v668_v7, %v667_v18 }
 0x1ef   :  { %1080 = vmatpush3.bf16.xpose.msra.mxu0 %v721_v6  ;;  %1100 = vmatpush3.bf16.xpose.msra.mxu1 %v721_v6 }
 0x1f0   :  { %1081 = vmatprep.subr.bf16.mxu0 %v1204_v12  ;;  %1101 = vmatprep.subr.bf16.mxu1 %v1204_v12  ;;  %v718_v19 = vsel %vm85_vm0, %v693_v17, 0 }
 0x1f7   :  { %1082 = vmatpush3.bf16.xpose.msra.mxu0 %v718_v19  ;;  %1102 = vmatpush3.bf16.xpose.msra.mxu1 %v718_v19 }
 0x1f8   :  { %1083 = vmatprep.subr.bf16.mxu0 %v1204_v12  ;;  %1103 = vmatprep.subr.bf16.mxu1 %v1204_v12 }
 0x1ff   :  { %1084 = vmatpush3.bf16.xpose.msra.mxu0 %v715_v43  ;;  %1104 = vmatpush3.bf16.xpose.msra.mxu1 %v715_v43 }
 0x200   :  { %1085 = vmatprep.subr.bf16.mxu0 %v1204_v12  ;;  %1105 = vmatprep.subr.bf16.mxu1 %v1204_v12 }
 0x207   :  { %1086 = vmatpush3.bf16.xpose.msra.mxu0 %v712_v24  ;;  %1106 = vmatpush3.bf16.xpose.msra.mxu1 %v712_v24 }
 0x208   :  { %1087 = vmatprep.subr.bf16.mxu0 %v1204_v12  ;;  %1107 = vmatprep.subr.bf16.mxu1 %v1204_v12 }
 0x20f   :  { %1088 = vmatpush3.bf16.xpose.msra.mxu0 %v709_v27  ;;  %1108 = vmatpush3.bf16.xpose.msra.mxu1 %v709_v27 }
 0x210   :  { %1089 = vmatprep.subr.bf16.mxu0 %v1204_v12  ;;  %1109 = vmatprep.subr.bf16.mxu1 %v1204_v12 }
 0x217   :  { %1090 = vmatpush3.bf16.xpose.msra.mxu0 %v706_v30  ;;  %1110 = vmatpush3.bf16.xpose.msra.mxu1 %v706_v30 }
 0x218   :  { %1091 = vmatprep.subr.bf16.mxu0 %v1204_v12  ;;  %1111 = vmatprep.subr.bf16.mxu1 %v1204_v12 }
 0x21f   :  { %1092 = vmatpush3.bf16.xpose.msra.mxu0 %v703_v63  ;;  %1112 = vmatpush3.bf16.xpose.msra.mxu1 %v703_v63 }
 0x220   :  { %1093 = vmatprep.subr.bf16.mxu0 %v1204_v12  ;;  %1113 = vmatprep.subr.bf16.mxu1 %v1204_v12 }
 0x227   :  { %1094 = vmatpush3.bf16.xpose.msra.mxu0 %v700_v5  ;;  %1114 = vmatpush3.bf16.xpose.msra.mxu1 %v700_v5 }
 0x228   :  { %1119 = vmatprep.subr.bf16.mxu0 %v1204_v12 }
 0x22e   :  { %1096 = vmatmul.mubr.msk.bf16.vlgmr.msra.gmra.mxu0 %vm85_vm0, %v695_v37  ;;  %1116 = vmatmul.mubr.msk.bf16.vlgmr.msra.gmra.mxu1 %vm85_vm0, %v763_v45 }
 0x22f   :  { %1120 = vmatpush3.bf16.msra.mxu0 %v1193_v52  ;;  %1135 = vmatprep.mubr.msk.bf16.mxu0 %vm1205_vm2, %v1204_v12 }
 0x230   :  { %1121 = vmatprep.subr.bf16.mxu0 %v1204_v12 }
 0x233   :  { %1122 = vmatpush3.bf16.msra.mxu0 %v1194_v46 }
 0x234   :  { %1123 = vmatprep.subr.bf16.mxu0 %v1204_v12 }
 0x237   :  { %1124 = vmatpush3.bf16.msra.mxu0 %v1195_v39 }
 0x238   :  { %1125 = vmatprep.subr.bf16.mxu0 %v1204_v12 }
 0x23b   :  { %1126 = vmatpush3.bf16.msra.mxu0 %v1196_v4 }
 0x23c   :  { %1127 = vmatprep.subr.bf16.mxu0 %v1204_v12 }
 0x23f   :  { %1128 = vmatpush3.bf16.msra.mxu0 %v1197_v22 }
 0x240   :  { %1129 = vmatprep.subr.bf16.mxu0 %v1204_v12 }
 0x243   :  { %1130 = vmatpush3.bf16.msra.mxu0 %v1198_v23 }
 0x244   :  { %1131 = vmatprep.subr.bf16.mxu0 %v1204_v12 }
 0x247   :  { %1132 = vmatpush3.bf16.msra.mxu0 %v1199_v11 }
 0x248   :  { %1133 = vmatprep.subr.bf16.mxu0 %v1204_v12 }
 0x24b   :  { %1134 = vmatpush3.bf16.msra.mxu0 %v1200_v31 }
 0x2ee   :  { %v757_v32 = vpop.f32.mrf.mxu0  ;;  %v801_v33 = vpop.f32.mrf.mxu1 }
 0x2ef   :  { %v807_v34 = vpack.c.bf16 %v757_v32, %v757_v32 }
 0x2f0   :  { %v1097_v28 = vpop.f32.mrf.mxu0  ;;  %v1117_v35 = vpop.f32.mrf.mxu1 }
 0x2f1   :  { %1136 = vmatmul.mubr.bf16.vlgmr.msra.gmra.mxu0 %v807_v34 }
 0x2f2   :  { %v760_v38 = vpop.f32.mrf.mxu0  ;;  %v804_v40 = vpop.f32.mrf.mxu1 }
 0x2f4   :  { %v1098_v41 = vpop.f32.mrf.mxu0  ;;  %v1118_v42 = vpop.f32.mrf.mxu1 }
 0x3b1   :  { %v906_v12 = vpop.f32.mrf.mxu0 }
 0x3b2   :  { %v907_v50 = vadd.f32 %v906_v12, %v801_v33 }
 0x3b3   :  { %v1137_v26 = vpop.f32.mrf.mxu0 }
 0x3b4   :  { %v922_v9 = vadd.f32 %v921_v49, %v907_v50 }
 0x3b5   :  { %v909_v51 = vpop.f32.mrf.mxu0 }
 0x3b6   :  { %1201 = vtanh.f32 %v922_v9 }
 0x3b7   :  { %v1138_v53 = vpop.f32.mrf.mxu0 }
 0x3c3   :  { %v1202_v54 = vpop.eup %1201 }
 0x3c4   :  { %924 = vst [vmem:[%s1688_s10] sm:$0x1] %v1202_v54 }

// kernel: graph_unet_forward.8
= control target key start
LH: loop header
LB: loop body
LE: loop exit
PB: predicated region body
PF: predicated region fallthrough
CT: control target
= control target key end

     0   :  { %v1217_v1 = vmov 0   ;;  %vm93_vm0 = vcmask 261120   ;;  %v1218_v15 = vmov 0.0   ;;  %s1699_s4 = inlined_call_operand.vmem [shape: bf16[32,16], index: 4, kind: input, shape index: {}]   ;;  %s1700_s3 = inlined_call_operand.vmem [shape: f32[128,32], index: 3, kind: input, shape index: {}]   ;;  %s1701_s8 = inlined_call_operand.<no memory space> [shape: f32[1,1], index: 8, kind: input, shape index: {}]   ;;  %s1702_s2 = inlined_call_operand.vmem [shape: f32[128,1], index: 2, kind: input, shape index: {}]   ;;  %s1703_s0 = inlined_call_operand.vmem [shape: bf16[128,128], index: 0, kind: input, shape index: {}]   ;;  %s1704_s1 = inlined_call_operand.vmem [shape: bf16[128,128], index: 1, kind: input, shape index: {}]   ;;  %s1705_s5 = inlined_call_operand.vmem [shape: f32[1,16], index: 5, kind: input, shape index: {}]   ;;  %s1706_s9 = inlined_call_operand.vmem [shape: f32[128,16], index: 9, kind: output, shape index: {0}]   ;;  %s1707_s6 = inlined_call_operand.vmem [shape: bf16[1,16], index: 6, kind: input, shape index: {}]   ;;  %s1708_s7 = inlined_call_operand.vmem [shape: bf16[1,16], index: 7, kind: input, shape index: {}]   ;;  %s1709_s10 = inlined_call_operand.vmem [shape: f32[1,128], index: 10, kind: output, shape index: {1}]  }
   0x1   :  { %v1197_v0 = vld [vmem:[%s1699_s4 + $0x8] sm:$0xff]   ;;  %1155 = vset.pattern.permute.xlu0 %v1217_v1  ;;  %1156 = vset.pattern.permute.xlu1 %v1217_v1  ;;  %v16_v2 = vstv %s1701_s8  ;;  %v1198_v3 = vld [vmem:[%s1699_s4] sm:$0xff]   ;;  %v55_v7 = vld [vmem:[%s1700_s3 + $0x10] sm:$0xff] }
   0x2   :  { %17 = vst [vmem:[#allocation2] sm:$0x1] %v16_v2  ;;  %1040 = vmatprep.subr.bf16.mxu0 %v1197_v0  ;;  %v53_v4 = vld [vmem:[%s1700_s3] sm:$0xff]  ;;  %v54_v5 = vld [vmem:[%s1700_s3 + $0x8] sm:$0xff]  ;;  %v56_v8 = vld [vmem:[%s1700_s3 + $0x18] sm:$0xff] }
   0x3   :  { %1041 = vmatpush3.bf16.msra.mxu0 %v1197_v0  ;;  %v69_v6 = vpack.c.bf16 %v54_v5, %v53_v4  ;;  %v57_v9 = vld [vmem:[%s1700_s3 + $0x20] sm:$0xff]  ;;  %v58_v10 = vld [vmem:[%s1700_s3 + $0x28] sm:$0xff]  ;;  %v70_v11 = vpack.c.bf16 %v56_v8, %v55_v7  ;;  %v51_v13 = vld [vmem:[%s1702_s2 + $0x70] sm:$0xff] }
   0x4   :  { %1042 = vmatprep.subr.bf16.mxu0 %v1198_v3  ;;  %v71_v12 = vpack.c.bf16 %v58_v10, %v57_v9  ;;  %303 = vperm.xlu0 %1155, %v51_v13   ;;  %v49_v14 = vld [vmem:[%s1702_s2 + $0x60] sm:$0xff]  ;;  %v52_v16 = vld [vmem:[%s1702_s2 + $0x78] sm:$0xff]  ;;  %v50_v17 = vld [vmem:[%s1702_s2 + $0x68] sm:$0xff]  ;;  %vm494_vm1 = vcmp.gt.f32.partialorder %v51_v13, 0.0 }
   0x5   :  { %1044 = vmatprep.mubr.msk.bf16.mxu0 %vm93_vm0, %v69_v6  ;;  %293 = vperm.xlu1 %1156, %v49_v14   ;;  %v59_v18 = vld [vmem:[%s1700_s3 + $0x30] sm:$0xff]  ;;  %v60_v19 = vld [vmem:[%s1700_s3 + $0x38] sm:$0xff]  ;;  %v61_v20 = vld [vmem:[%s1700_s3 + $0x40] sm:$0xff]  ;;  %vm495_vm2 = vcmp.gt.f32.partialorder %v52_v16, 0.0  ;;  %vm492_vm3 = vcmp.gt.f32.partialorder %v49_v14, 0.0  ;;  %vm493_vm4 = vcmp.gt.f32.partialorder %v50_v17, 0.0 }
   0x6   :  { %v62_v21 = vld [vmem:[%s1700_s3 + $0x48] sm:$0xff]  ;;  %v47_v22 = vld [vmem:[%s1702_s2 + $0x50] sm:$0xff]  ;;  %v72_v23 = vpack.c.bf16 %v60_v19, %v59_v18  ;;  %v48_v24 = vld [vmem:[%s1702_s2 + $0x58] sm:$0xff]  ;;  %v974_v43 = vsel %vm494_vm1, 1.0, %v1218_v15  ;;  %v975_v44 = vsel %vm495_vm2, 1.0, %v1218_v15  ;;  %v972_v46 = vsel %vm492_vm3, 1.0, %v1218_v15 }
   0x7   :  { %1043 = vmatpush3.bf16.msra.mxu0 %v1198_v3  ;;  %v73_v25 = vpack.c.bf16 %v62_v21, %v61_v20  ;;  %v45_v26 = vld [vmem:[%s1702_s2 + $0x40] sm:$0xff]  ;;  %v46_v27 = vld [vmem:[%s1702_s2 + $0x48] sm:$0xff]  ;;  %v63_v28 = vld [vmem:[%s1700_s3 + $0x50] sm:$0xff]  ;;  %v973_v47 = vsel %vm493_vm4, 1.0, %v1218_v15  ;;  %vm490_vm5 = vcmp.gt.f32.partialorder %v47_v22, 0.0  ;;  %vm491_vm6 = vcmp.gt.f32.partialorder %v48_v24, 0.0 }
   0x8   :  { %1092 = vmatprep.subr.bf16.mxu0 %v1218_v15  ;;  %308 = vperm.xlu0 %1155, %v52_v16   ;;  %v64_v29 = vld [vmem:[%s1700_s3 + $0x58] sm:$0xff]  ;;  %v65_v30 = vld [vmem:[%s1700_s3 + $0x60] sm:$0xff]  ;;  %v66_v31 = vld [vmem:[%s1700_s3 + $0x68] sm:$0xff]  ;;  %vm488_vm7 = vcmp.gt.f32.partialorder %v45_v26, 0.0  ;;  %vm489_vm8 = vcmp.gt.f32.partialorder %v46_v27, 0.0  ;;  %v1157_v49 = vpack.i.bf16 %v975_v44, %v974_v43  ;;  %v970_v50 = vsel %vm490_vm5, 1.0, %v1218_v15 }
   0x9   :  { %298 = vperm.xlu1 %1156, %v50_v17   ;;  %v43_v32 = vld [vmem:[%s1702_s2 + $0x30] sm:$0xff]  ;;  %v74_v33 = vpack.c.bf16 %v64_v29, %v63_v28  ;;  %v44_v34 = vld [vmem:[%s1702_s2 + $0x38] sm:$0xff]  ;;  %v75_v35 = vpack.c.bf16 %v66_v31, %v65_v30  ;;  %v41_v36 = vld [vmem:[%s1702_s2 + $0x20] sm:$0xff]  ;;  %v971_v51 = vsel %vm491_vm6, 1.0, %v1218_v15  ;;  %v1162_v52 = vpack.i.bf16 %v973_v47, %v972_v46 }
   0xa   :  { %1045 = vmatmul.mubr.msk.bf16.vlgmr.msra.gmra.mxu0 %vm93_vm0, %v70_v11  ;;  %v42_v37 = vld [vmem:[%s1702_s2 + $0x28] sm:$0xff]  ;;  %v67_v38 = vld [vmem:[%s1700_s3 + $0x70] sm:$0xff]  ;;  %v68_v39 = vld [vmem:[%s1700_s3 + $0x78] sm:$0xff]  ;;  %v968_v53 = vsel %vm488_vm7, 1.0, %v1218_v15  ;;  %v969_v54 = vsel %vm489_vm8, 1.0, %v1218_v15  ;;  %vm486_vm9 = vcmp.gt.f32.partialorder %v43_v32, 0.0  ;;  %v1167_v55 = vpack.i.bf16 %v971_v51, %v970_v50 }
   0xb   :  { %1048 = vmatprep.mubr.msk.bf16.mxu0 %vm93_vm0, %v71_v12  ;;  %v39_v40 = vld [vmem:[%s1702_s2 + $0x10] sm:$0xff]  ;;  %v76_v41 = vpack.c.bf16 %v68_v39, %v67_v38  ;;  %v40_v42 = vld [vmem:[%s1702_s2 + $0x18] sm:$0xff]  ;;  %v37_v45 = vld [vmem:[%s1702_s2] sm:$0xff]  ;;  %vm487_vm10 = vcmp.gt.f32.partialorder %v44_v34, 0.0  ;;  %vm484_vm11 = vcmp.gt.f32.partialorder %v41_v36, 0.0  ;;  %vm485_vm12 = vcmp.gt.f32.partialorder %v42_v37, 0.0 }
   0xc   :  { %283 = vperm.xlu0 %1155, %v47_v22   ;;  %v38_v48 = vld [vmem:[%s1702_s2 + $0x8] sm:$0xff]  ;;  %v966_v56 = vsel %vm486_vm9, 1.0, %v1218_v15  ;;  %v967_v57 = vsel %vm487_vm10, 1.0, %v1218_v15  ;;  %v1172_v58 = vpack.i.bf16 %v969_v54, %v968_v53  ;;  %v964_v59 = vsel %vm484_vm11, 1.0, %v1218_v15  ;;  %v921_v5 = vld [vmem:[#allocation2] sm:$0x1] }
   0xd   :  { %288 = vperm.xlu1 %1156, %v48_v24   ;;  %v965_v60 = vsel %vm485_vm12, 1.0, %v1218_v15  ;;  %vm482_vm13 = vcmp.gt.f32.partialorder %v39_v40, 0.0  ;;  %vm483_vm14 = vcmp.gt.f32.partialorder %v40_v42, 0.0  ;;  %vm480_vm15 = vcmp.gt.f32.partialorder %v37_v45, 0.0  ;;  %v1199_v6 = vld [vmem:[%s1703_s0] sm:$0xff]  }
   0xe   :  { %v1177_v61 = vpack.i.bf16 %v967_v57, %v966_v56  ;;  %v962_v62 = vsel %vm482_vm13, 1.0, %v1218_v15  ;;  %v963_v63 = vsel %vm483_vm14, 1.0, %v1218_v15  ;;  %v1182_v0 = vpack.i.bf16 %v965_v60, %v964_v59  ;;  %1076 = vmatprep.mubr.bf16.mxu1 %v1199_v6  ;;  %v1206_v6 = vld [vmem:[%s1703_s0 + $0x38] sm:$0xff]  }
   0xf   :  { %v960_v1 = vsel %vm480_vm15, 1.0, %v1218_v15  ;;  %v1187_v3 = vpack.i.bf16 %v963_v63, %v962_v62  ;;  %vm1219_vm1 = vmmov 0   ;;  %vm679_vm2 = vcmask 130048  }
  0x10   :  { %273 = vperm.xlu0 %1155, %v45_v26  }
  0x11   :  { %278 = vperm.xlu1 %1156, %v46_v27  }
  0x12   :  { %1049 = vmatmul.mubr.msk.bf16.gmra.mxu0 %vm93_vm0, %v72_v23 }
  0x13   :  { %1052 = vmatprep.mubr.msk.bf16.mxu0 %vm93_vm0, %v73_v25 }
  0x14   :  { %263 = vperm.xlu0 %1155, %v43_v32  }
  0x15   :  { %268 = vperm.xlu1 %1156, %v44_v34  }
  0x18   :  { %253 = vperm.xlu0 %1155, %v41_v36  }
  0x19   :  { %258 = vperm.xlu1 %1156, %v42_v37  }
  0x1a   :  { %1053 = vmatmul.mubr.msk.bf16.gmra.mxu0 %vm93_vm0, %v74_v33 }
  0x1b   :  { %1056 = vmatprep.mubr.msk.bf16.mxu0 %vm93_vm0, %v75_v35 }
  0x1c   :  { %243 = vperm.xlu0 %1155, %v39_v40  }
  0x1d   :  { %248 = vperm.xlu1 %1156, %v40_v42  }
  0x20   :  { %233 = vperm.xlu0 %1155, %v37_v45  }
  0x21   :  { %238 = vperm.xlu1 %1156, %v38_v48  }
  0x22   :  { %1057 = vmatmul.mubr.msk.bf16.gmra.mxu0 %vm93_vm0, %v76_v41  ;;  %vm481_vm0 = vcmp.gt.f32.partialorder %v38_v48, 0.0 }
  0x23   :  { %v961_v2 = vsel %vm481_vm0, 1.0, %v1218_v15  ;;  %1108 = vmatprep.mubr.msk.bf16.mxu0 %vm1219_vm1, %v1218_v15 }
  0x24   :  { %1158 = vperm.xlu0 %1155, %v1157_v49   ;;  %v1192_v4 = vpack.i.bf16 %v961_v2, %v960_v1  ;;  %v1201_v1 = vld [vmem:[%s1703_s0 + $0x10] sm:$0xff]   ;;  %v1202_v2 = vld [vmem:[%s1703_s0 + $0x18] sm:$0xff]  }
  0x25   :  { %1163 = vperm.xlu1 %1156, %v1162_v52  }
  0x28   :  { %1168 = vperm.xlu0 %1155, %v1167_v55  }
  0x29   :  { %1173 = vperm.xlu1 %1156, %v1172_v58  }
  0x2c   :  { %1178 = vperm.xlu0 %1155, %v1177_v61  }
  0x2d   :  { %1183 = vperm.xlu1 %1156, %v1182_v0   ;;  %v1200_v0 = vld [vmem:[%s1703_s0 + $0x8] sm:$0xff]  }
  0x30   :  { %1188 = vperm.xlu0 %1155, %v1187_v3   ;;  %v1203_v3 = vld [vmem:[%s1703_s0 + $0x20] sm:$0xff]  }
  0x31   :  { %1193 = vperm.xlu1 %1156, %v1192_v4   ;;  %v1204_v4 = vld [vmem:[%s1703_s0 + $0x28] sm:$0xff]  }
  0x34   :  { %924 = vperm.xlu0 %1155, %v921_v5   ;;  %v1205_v5 = vld [vmem:[%s1703_s0 + $0x30] sm:$0xff]  }
  0x7f   :  { %v1412_v13 = vpop.permute.xlu0 %303 }
  0x80   :  { %v1410_v11 = vpop.permute.xlu1 %293 }
  0x83   :  { %v1416_v19 = vpop.permute.xlu0 %308 }
  0x84   :  { %v1414_v17 = vpop.permute.xlu1 %298 }
  0x87   :  { %v1420_v24 = vpop.permute.xlu0 %283 }
  0x88   :  { %v1418_v22 = vpop.permute.xlu1 %288 }
  0x8b   :  { %v1424_v29 = vpop.permute.xlu0 %273 }
  0x8c   :  { %v1422_v27 = vpop.permute.xlu1 %278 }
  0x8f   :  { %v1433_v40 = vpop.permute.xlu0 %263 }
  0x90   :  { %v1430_v37 = vpop.permute.xlu1 %268 }
  0x93   :  { %v1440_v46 = vpop.permute.xlu0 %253 }
  0x94   :  { %v1437_v44 = vpop.permute.xlu1 %258 }
  0x97   :  { %v244_v53 = vpop.permute.xlu0 %243 }
  0x98   :  { %v249_v50 = vpop.permute.xlu1 %248 }
  0x9b   :  { %v234_v59 = vpop.permute.xlu0 %233 }
  0x9c   :  { %v239_v57 = vpop.permute.xlu1 %238 }
  0xca   :  { %v1046_v7 = vpop.f32.mrf.mxu0 }
  0xcb   :  { %v313_v58 = vmul.f32 %v1046_v7, %v244_v53  ;;  %v1473_v7 = vpop.permute.xlu1 %1163 }
  0xcc   :  { %v1408_v8 = vpop.f32.mrf.mxu0 }
  0xcd   :  { %v311_v62 = vmul.f32 %v234_v59, %v1408_v8  ;;  %v1475_v8 = vpop.permute.xlu0 %1158 }
  0xce   :  { %v1047_v9 = vpop.f32.mrf.mxu0 }
  0xcf   :  { %v314_v55 = vmul.f32 %v1047_v9, %v249_v50  ;;  %v1477_v9 = vpop.permute.xlu1 %1173 }
  0xd0   :  { %v155_v10 = vpop.f32.mrf.mxu0 }
  0xd1   :  { %v328_v60 = vpack.c.bf16 %v314_v55, %v313_v58  ;;  %v312_v61 = vmul.f32 %v239_v57, %v155_v10  ;;  %v1479_v10 = vpop.permute.xlu0 %1168 }
  0xd2   :  { %v1050_v12 = vpop.f32.mrf.mxu0 }
  0xd3   :  { %v317_v49 = vmul.f32 %v1050_v12, %v1433_v40  ;;  %v327_v63 = vpack.c.bf16 %v312_v61, %v311_v62  ;;  %v1481_v12 = vpop.permute.xlu1 %1183 }
  0xd4   :  { %v168_v14 = vpop.f32.mrf.mxu0  ;;  %v1185_v62 = vunpack.i.l.bf16 %v1481_v12 }
  0xd5   :  { %v315_v54 = vmul.f32 %v1440_v46, %v168_v14  ;;  %v1483_v14 = vpop.permute.xlu0 %1178 }
  0xd6   :  { %v1051_v16 = vpop.f32.mrf.mxu0 }
  0xd7   :  { %v318_v47 = vmul.f32 %v1051_v16, %v1430_v37 }
  0xd8   :  { %v171_v18 = vpop.f32.mrf.mxu0 }
  0xd9   :  { %v330_v51 = vpack.c.bf16 %v318_v47, %v317_v49  ;;  %v316_v52 = vmul.f32 %v1437_v44, %v171_v18  ;;  %v1488_v18 = vld [vmem:[%s1705_s5] ss:$0 sm:$0xff] }
  0xda   :  { %v1054_v20 = vpop.f32.mrf.mxu0 }
  0xdb   :  { %v321_v41 = vmul.f32 %v1054_v20, %v1420_v24  ;;  %v329_v56 = vpack.c.bf16 %v316_v52, %v315_v54 }
  0xdc   :  { %v184_v21 = vpop.f32.mrf.mxu0 }
  0xdd   :  { %v319_v45 = vmul.f32 %v1424_v29, %v184_v21 }
  0xde   :  { %v1055_v23 = vpop.f32.mrf.mxu0 }
  0xdf   :  { %v322_v38 = vmul.f32 %v1055_v23, %v1418_v22  ;;  %v1194_v23 = vpop.permute.xlu1 %1193 }
  0xe0   :  { %v187_v25 = vpop.f32.mrf.mxu0 }
  0xe1   :  { %v332_v42 = vpack.c.bf16 %v322_v38, %v321_v41  ;;  %v320_v43 = vmul.f32 %v1422_v27, %v187_v25 }
  0xe2   :  { %v1058_v26 = vpop.f32.mrf.mxu0 }
  0xe3   :  { %v325_v31 = vmul.f32 %v1058_v26, %v1412_v13  ;;  %v331_v48 = vpack.c.bf16 %v320_v43, %v319_v45 }
  0xe4   :  { %v200_v28 = vpop.f32.mrf.mxu0 }
  0xe5   :  { %v323_v34 = vmul.f32 %v1410_v11, %v200_v28  ;;  %v1189_v28 = vpop.permute.xlu0 %1188 }
  0xe6   :  { %v1059_v30 = vpop.f32.mrf.mxu0  ;;  %v1191_v43 = vunpack.i.h.bf16 %v1189_v28 }
  0xe7   :  { %v326_v32 = vmul.f32 %v1059_v30, %v1416_v19 }
  0xe8   :  { %v203_v33 = vpop.f32.mrf.mxu0 }
  0xe9   :  { %v324_v35 = vmul.f32 %v1414_v17, %v203_v33  ;;  %v334_v36 = vpack.c.bf16 %v326_v32, %v325_v31  ;;  %v1190_v31 = vunpack.i.l.bf16 %v1189_v28 }
  0xeb   :  { %v333_v39 = vpack.c.bf16 %v324_v35, %v323_v34  ;;  %1060 = vmatprep.subr.bf16.mxu1 %v334_v36  ;;  %v1195_v35 = vunpack.i.l.bf16 %v1194_v23 }
  0xec   :  { %1061 = vmatpush3.bf16.msra.mxu1 %v334_v36 }
  0xed   :  { %1062 = vmatprep.subr.bf16.mxu1 %v333_v39 }
  0xf0   :  { %1063 = vmatpush3.bf16.msra.mxu1 %v333_v39 }
  0xf1   :  { %1064 = vmatprep.subr.bf16.mxu1 %v332_v42 }
  0xf4   :  { %1065 = vmatpush3.bf16.msra.mxu1 %v332_v42 }
  0xf5   :  { %1066 = vmatprep.subr.bf16.mxu1 %v331_v48 }
  0xf8   :  { %1067 = vmatpush3.bf16.msra.mxu1 %v331_v48 }
  0xf9   :  { %1068 = vmatprep.subr.bf16.mxu1 %v330_v51 }
  0xfc   :  { %1069 = vmatpush3.bf16.msra.mxu1 %v330_v51  ;;  %v1196_v51 = vunpack.i.h.bf16 %v1194_v23 }
  0xfd   :  { %1070 = vmatprep.subr.bf16.mxu1 %v329_v56 }
 0x100   :  { %1071 = vmatpush3.bf16.msra.mxu1 %v329_v56 }
 0x101   :  { %1072 = vmatprep.subr.bf16.mxu1 %v328_v60 }
 0x104   :  { %1073 = vmatpush3.bf16.msra.mxu1 %v328_v60 }
 0x105   :  { %1074 = vmatprep.subr.bf16.mxu1 %v327_v63 }
 0x108   :  { %1075 = vmatpush3.bf16.msra.mxu1 %v327_v63 }
 0x109   :  { %1112 = vmatprep.subr.bf16.mxu1 %v1218_v15 }
 0x10b   :  { %1077 = vmatmul.mubr.bf16.vlgmr.msra.gmra.mxu1 %v1200_v0 }
 0x10c   :  { %1080 = vmatprep.mubr.bf16.mxu1 %v1201_v1 }
 0x113   :  { %1081 = vmatmul.mubr.bf16.gmra.mxu1 %v1202_v2 }
 0x114   :  { %1084 = vmatprep.mubr.bf16.mxu1 %v1203_v3 }
 0x11b   :  { %1085 = vmatmul.mubr.bf16.gmra.mxu1 %v1204_v4 }
 0x11c   :  { %1088 = vmatprep.mubr.bf16.mxu1 %v1205_v5 }
 0x123   :  { %1089 = vmatmul.mubr.bf16.gmra.mxu1 %v1206_v6 }
 0x124   :  { %1128 = vmatprep.mubr.msk.bf16.mxu1 %vm1219_vm1, %v1218_v15 }
 0x1cb   :  { %v1078_v16 = vpop.f32.mrf.mxu1 }
 0x1cc   :  { %v530_v20 = vmul.f32 %v1078_v16, %v244_v53 }
 0x1cd   :  { %v417_v21 = vpop.f32.mrf.mxu1 }
 0x1ce   :  { %v553_v25 = vadd.f32 %v1488_v18, %v530_v20  ;;  %v528_v26 = vmul.f32 %v417_v21, %v234_v59 }
 0x1cf   :  { %v1079_v30 = vpop.f32.mrf.mxu1 }
 0x1d0   :  { %v569_v32 = vmax.f32 %v553_v25, 0.0  ;;  %v551_v33 = vadd.f32 %v1488_v18, %v528_v26  ;;  %v531_v34 = vmul.f32 %v1079_v30, %v249_v50  ;;  %v1170_v30 = vunpack.i.l.bf16 %v1479_v10 }
 0x1d1   :  { %v420_v36 = vpop.f32.mrf.mxu1 }
 0x1d2   :  { %v1492_v38 = vmul.f32 %v1190_v31, %v569_v32  ;;  %v567_v39 = vmax.f32 %v551_v33, 0.0  ;;  %v554_v41 = vadd.f32 %v1488_v18, %v531_v34  ;;  %v529_v42 = vmul.f32 %v420_v36, %v239_v57 }
 0x1d3   :  { %v1082_v45 = vpop.f32.mrf.mxu1  ;;  %v1180_v57 = vunpack.i.l.bf16 %v1483_v14  ;;  %v1175_v34 = vunpack.i.l.bf16 %v1477_v9 }
 0x1d4   :  { %682 = vst.msk [vmem:[%s1706_s9 + $0x10] sm:$0xff] %vm679_vm2, %v1492_v38  ;;  %v1500_v47 = vmul.f32 %v1195_v35, %v567_v39  ;;  %v570_v48 = vmax.f32 %v554_v41, 0.0  ;;  %v552_v49 = vadd.f32 %v1488_v18, %v529_v42  ;;  %v534_v50 = vmul.f32 %v1082_v45, %v1433_v40 }
 0x1d5   :  { %v433_v52 = vpop.f32.mrf.mxu1  ;;  %v1171_v42 = vunpack.i.h.bf16 %v1479_v10 }
 0x1d6   :  { %680 = vst.msk [vmem:[%s1706_s9] sm:$0xff] %vm679_vm2, %v1500_v47  ;;  %v1509_v53 = vmul.f32 %v1191_v43, %v570_v48  ;;  %v568_v54 = vmax.f32 %v552_v49, 0.0  ;;  %v557_v55 = vadd.f32 %v1488_v18, %v534_v50  ;;  %v532_v56 = vmul.f32 %v433_v52, %v1440_v46 }
 0x1d7   :  { %v1083_v58 = vpop.f32.mrf.mxu1  ;;  %v1176_v50 = vunpack.i.h.bf16 %v1477_v9 }
 0x1d8   :  { %683 = vst.msk [vmem:[%s1706_s9 + $0x18] sm:$0xff] %vm679_vm2, %v1509_v53  ;;  %v1519_v40 = vmul.f32 %v1196_v51, %v568_v54  ;;  %v573_v59 = vmax.f32 %v557_v55, 0.0  ;;  %v555_v60 = vadd.f32 %v1488_v18, %v532_v56  ;;  %v535_v61 = vmul.f32 %v1083_v58, %v1430_v37 }
 0x1d9   :  { %v436_v63 = vpop.f32.mrf.mxu1  ;;  %v697_v46 = vpack.c.bf16 %v1509_v53, %v1492_v38  ;;  %v1181_v37 = vunpack.i.h.bf16 %v1483_v14  ;;  %v1160_v55 = vunpack.i.l.bf16 %v1475_v8  ;;  %v704_v38 = vld [vmem:[%s1707_s6] sm:$0x1]  ;;  %v1207_v53 = vld [vmem:[%s1704_s1 + $0x38] sm:$0xff]  }
 0x1da   :  { %681 = vst.msk [vmem:[%s1706_s9 + $0x8] sm:$0xff] %vm679_vm2, %v1519_v40  ;;  %v1531_v0 = vmul.f32 %v1180_v57, %v573_v59  ;;  %v571_v1 = vmax.f32 %v555_v60, 0.0  ;;  %v558_v2 = vadd.f32 %v1488_v18, %v535_v61  ;;  %v533_v3 = vmul.f32 %v436_v63, %v1437_v44 }
 0x1db   :  { %v1086_v4 = vpop.f32.mrf.mxu1  ;;  %v696_v5 = vpack.c.bf16 %v1519_v40, %v1500_v47  ;;  %v1186_v44 = vunpack.i.h.bf16 %v1481_v12  ;;  %v1165_v59 = vunpack.i.l.bf16 %v1473_v7  ;;  %v1208_v47 = vld [vmem:[%s1704_s1 + $0x30] sm:$0xff]   ;;  %v1209_v40 = vld [vmem:[%s1704_s1 + $0x28] sm:$0xff]  }
 0x1dc   :  { %686 = vst.msk [vmem:[%s1706_s9 + $0x30] sm:$0xff] %vm679_vm2, %v1531_v0  ;;  %v1543_v6 = vmul.f32 %v1185_v62, %v571_v1  ;;  %v574_v16 = vmax.f32 %v558_v2, 0.0  ;;  %v556_v20 = vadd.f32 %v1488_v18, %v533_v3  ;;  %v538_v21 = vmul.f32 %v1086_v4, %v1420_v24 }
 0x1dd   :  { %v449_v14 = vpop.f32.mrf.mxu1  ;;  %v1161_v1 = vunpack.i.h.bf16 %v1475_v8 }
 0x1de   :  { %684 = vst.msk [vmem:[%s1706_s9 + $0x20] sm:$0xff] %vm679_vm2, %v1543_v6  ;;  %v1553_v23 = vmul.f32 %v1181_v37, %v574_v16  ;;  %v572_v25 = vmax.f32 %v556_v20, 0.0  ;;  %v561_v26 = vadd.f32 %v1488_v18, %v538_v21  ;;  %v536_v28 = vmul.f32 %v449_v14, %v1424_v29 }
 0x1df   :  { %v1087_v31 = vpop.f32.mrf.mxu1  ;;  %v1166_v37 = vunpack.i.h.bf16 %v1473_v7 }
 0x1e0   :  { %687 = vst.msk [vmem:[%s1706_s9 + $0x38] sm:$0xff] %vm679_vm2, %v1553_v23  ;;  %v1563_v24 = vmul.f32 %v1186_v44, %v572_v25  ;;  %v577_v12 = vmax.f32 %v561_v26, 0.0  ;;  %v559_v32 = vadd.f32 %v1488_v18, %v536_v28  ;;  %v539_v33 = vmul.f32 %v1087_v31, %v1418_v22 }
 0x1e1   :  { %v452_v35 = vpop.f32.mrf.mxu1  ;;  %v699_v26 = vpack.c.bf16 %v1553_v23, %v1531_v0  ;;  %v712_v0 = vsel %vm679_vm2, %v697_v46, 0  ;;  %v772_v46 = vld [vmem:[%s1708_s7] sm:$0x1]  ;;  %v1211_v23 = vld [vmem:[%s1704_s1 + $0x18] sm:$0xff]  }
 0x1e2   :  { %685 = vst.msk [vmem:[%s1706_s9 + $0x28] sm:$0xff] %vm679_vm2, %v1563_v24  ;;  %v673_v29 = vmul.f32 %v1170_v30, %v577_v12  ;;  %v575_v36 = vmax.f32 %v559_v32, 0.0  ;;  %v562_v39 = vadd.f32 %v1488_v18, %v539_v33  ;;  %v537_v41 = vmul.f32 %v452_v35, %v1422_v27  ;;  %v1213_v12 = vld [vmem:[%s1704_s1 + $0x8] sm:$0xff]   ;;  %v1214_v32 = vld [vmem:[%s1704_s1] sm:$0xff]  }
 0x1e3   :  { %v1090_v43 = vpop.f32.mrf.mxu1  ;;  %v718_v28 = vsel %vm679_vm2, %v699_v26, 0  ;;  %v698_v30 = vpack.c.bf16 %v1563_v24, %v1543_v6  ;;  %v709_v6 = vsel %vm679_vm2, %v696_v5, 0  ;;  %v1210_v5 = vld [vmem:[%s1704_s1 + $0x20] sm:$0xff]   ;;  %v1212_v24 = vld [vmem:[%s1704_s1 + $0x10] sm:$0xff]  }
 0x1e4   :  { %690 = vst.msk [vmem:[%s1706_s9 + $0x50] sm:$0xff] %vm679_vm2, %v673_v29  ;;  %v671_v22 = vmul.f32 %v1175_v34, %v575_v36  ;;  %v578_v45 = vmax.f32 %v562_v39, 0.0  ;;  %v560_v48 = vadd.f32 %v1488_v18, %v537_v41  ;;  %v542_v49 = vmul.f32 %v1090_v43, %v1412_v13 }
 0x1e5   :  { %v465_v51 = vpop.f32.mrf.mxu1  ;;  %v715_v31 = vsel %vm679_vm2, %v698_v30, 0 }
 0x1e6   :  { %688 = vst.msk [vmem:[%s1706_s9 + $0x40] sm:$0xff] %vm679_vm2, %v671_v22  ;;  %v674_v27 = vmul.f32 %v1171_v42, %v578_v45  ;;  %v576_v10 = vmax.f32 %v560_v48, 0.0  ;;  %v565_v52 = vadd.f32 %v1488_v18, %v542_v49  ;;  %v540_v54 = vmul.f32 %v465_v51, %v1410_v11  ;;  %v925_v49 = vpop.permute.xlu0 %924 }
 0x1e7   :  { %v1091_v56 = vpop.f32.mrf.mxu1 }
 0x1e8   :  { %691 = vst.msk [vmem:[%s1706_s9 + $0x58] sm:$0xff] %vm679_vm2, %v674_v27  ;;  %v672_v13 = vmul.f32 %v1176_v50, %v576_v10  ;;  %v581_v9 = vmax.f32 %v565_v52, 0.0  ;;  %v563_v57 = vadd.f32 %v1488_v18, %v540_v54  ;;  %v543_v58 = vmul.f32 %v1091_v56, %v1416_v19 }
 0x1e9   :  { %v468_v60 = vpop.f32.mrf.mxu1  ;;  %v701_v21 = vpack.c.bf16 %v674_v27, %v673_v29 }
 0x1ea   :  { %689 = vst.msk [vmem:[%s1706_s9 + $0x48] sm:$0xff] %vm679_vm2, %v672_v13  ;;  %v677_v11 = vmul.f32 %v1160_v55, %v581_v9  ;;  %v579_v61 = vmax.f32 %v563_v57, 0.0  ;;  %v566_v62 = vadd.f32 %v1488_v18, %v543_v58  ;;  %v541_v63 = vmul.f32 %v468_v60, %v1414_v17 }
 0x1eb   :  { %v724_v44 = vsel %vm679_vm2, %v701_v21, 0  ;;  %v700_v14 = vpack.c.bf16 %v672_v13, %v671_v22  ;;  %v927_v22 = vlaneseq }
 0x1ec   :  { %694 = vst.msk [vmem:[%s1706_s9 + $0x70] sm:$0xff] %vm679_vm2, %v677_v11  ;;  %v675_v19 = vmul.f32 %v1165_v59, %v579_v61  ;;  %v582_v2 = vmax.f32 %v566_v62, 0.0  ;;  %v564_v3 = vadd.f32 %v1488_v18, %v541_v63 }
 0x1ed   :  { %v721_v25 = vsel %vm679_vm2, %v700_v14, 0  ;;  %v928_v45 = vshrl.u32 %v927_v22, 7 }
 0x1ee   :  { %692 = vst.msk [vmem:[%s1706_s9 + $0x60] sm:$0xff] %vm679_vm2, %v675_v19  ;;  %v678_v4 = vmul.f32 %v1161_v1, %v582_v2  ;;  %v580_v17 = vmax.f32 %v564_v3, 0.0 }
 0x1ef   :  { %v929_v48 = vsub.s32 0, %v928_v45 }
 0x1f0   :  { %695 = vst.msk [vmem:[%s1706_s9 + $0x78] sm:$0xff] %vm679_vm2, %v678_v4  ;;  %v676_v8 = vmul.f32 %v1166_v37, %v580_v17  ;;  %v703_v16 = vpack.c.bf16 %v678_v4, %v677_v11 }
 0x1f1   :  { %v930_v50 = vrot.slane %v925_v49, %v929_v48 }
 0x1f2   :  { %693 = vst.msk [vmem:[%s1706_s9 + $0x68] sm:$0xff] %vm679_vm2, %v676_v8  ;;  %v730_v7 = vsel %vm679_vm2, %v703_v16, 0  ;;  %v702_v18 = vpack.c.bf16 %v676_v8, %v675_v19 }
 0x1f3   :  { %1093 = vmatpush3.bf16.xpose.msra.mxu0 %v730_v7  ;;  %1113 = vmatpush3.bf16.xpose.msra.mxu1 %v730_v7 }
 0x1f4   :  { %1094 = vmatprep.subr.bf16.mxu0 %v1218_v15  ;;  %1114 = vmatprep.subr.bf16.mxu1 %v1218_v15  ;;  %v727_v20 = vsel %vm679_vm2, %v702_v18, 0 }
 0x1fb   :  { %1095 = vmatpush3.bf16.xpose.msra.mxu0 %v727_v20  ;;  %1115 = vmatpush3.bf16.xpose.msra.mxu1 %v727_v20 }
 0x1fc   :  { %1096 = vmatprep.subr.bf16.mxu0 %v1218_v15  ;;  %1116 = vmatprep.subr.bf16.mxu1 %v1218_v15 }
 0x203   :  { %1097 = vmatpush3.bf16.xpose.msra.mxu0 %v724_v44  ;;  %1117 = vmatpush3.bf16.xpose.msra.mxu1 %v724_v44 }
 0x204   :  { %1098 = vmatprep.subr.bf16.mxu0 %v1218_v15  ;;  %1118 = vmatprep.subr.bf16.mxu1 %v1218_v15 }
 0x20b   :  { %1099 = vmatpush3.bf16.xpose.msra.mxu0 %v721_v25  ;;  %1119 = vmatpush3.bf16.xpose.msra.mxu1 %v721_v25 }
 0x20c   :  { %1100 = vmatprep.subr.bf16.mxu0 %v1218_v15  ;;  %1120 = vmatprep.subr.bf16.mxu1 %v1218_v15 }
 0x213   :  { %1101 = vmatpush3.bf16.xpose.msra.mxu0 %v718_v28  ;;  %1121 = vmatpush3.bf16.xpose.msra.mxu1 %v718_v28 }
 0x214   :  { %1102 = vmatprep.subr.bf16.mxu0 %v1218_v15  ;;  %1122 = vmatprep.subr.bf16.mxu1 %v1218_v15 }
 0x21b   :  { %1103 = vmatpush3.bf16.xpose.msra.mxu0 %v715_v31  ;;  %1123 = vmatpush3.bf16.xpose.msra.mxu1 %v715_v31 }
 0x21c   :  { %1104 = vmatprep.subr.bf16.mxu0 %v1218_v15  ;;  %1124 = vmatprep.subr.bf16.mxu1 %v1218_v15 }
 0x223   :  { %1105 = vmatpush3.bf16.xpose.msra.mxu0 %v712_v0  ;;  %1125 = vmatpush3.bf16.xpose.msra.mxu1 %v712_v0 }
 0x224   :  { %1106 = vmatprep.subr.bf16.mxu0 %v1218_v15  ;;  %1126 = vmatprep.subr.bf16.mxu1 %v1218_v15 }
 0x22b   :  { %1107 = vmatpush3.bf16.xpose.msra.mxu0 %v709_v6  ;;  %1127 = vmatpush3.bf16.xpose.msra.mxu1 %v709_v6 }
 0x22c   :  { %1132 = vmatprep.subr.bf16.mxu0 %v1218_v15 }
 0x232   :  { %1109 = vmatmul.mubr.msk.bf16.vlgmr.msra.gmra.mxu0 %vm679_vm2, %v704_v38  ;;  %1129 = vmatmul.mubr.msk.bf16.vlgmr.msra.gmra.mxu1 %vm679_vm2, %v772_v46 }
 0x233   :  { %1133 = vmatpush3.bf16.msra.mxu0 %v1207_v53  ;;  %1148 = vmatprep.mubr.msk.bf16.mxu0 %vm1219_vm1, %v1218_v15 }
 0x234   :  { %1134 = vmatprep.subr.bf16.mxu0 %v1218_v15 }
 0x237   :  { %1135 = vmatpush3.bf16.msra.mxu0 %v1208_v47 }
 0x238   :  { %1136 = vmatprep.subr.bf16.mxu0 %v1218_v15 }
 0x23b   :  { %1137 = vmatpush3.bf16.msra.mxu0 %v1209_v40 }
 0x23c   :  { %1138 = vmatprep.subr.bf16.mxu0 %v1218_v15 }
 0x23f   :  { %1139 = vmatpush3.bf16.msra.mxu0 %v1210_v5 }
 0x240   :  { %1140 = vmatprep.subr.bf16.mxu0 %v1218_v15 }
 0x243   :  { %1141 = vmatpush3.bf16.msra.mxu0 %v1211_v23 }
 0x244   :  { %1142 = vmatprep.subr.bf16.mxu0 %v1218_v15 }
 0x247   :  { %1143 = vmatpush3.bf16.msra.mxu0 %v1212_v24 }
 0x248   :  { %1144 = vmatprep.subr.bf16.mxu0 %v1218_v15 }
 0x24b   :  { %1145 = vmatpush3.bf16.msra.mxu0 %v1213_v12 }
 0x24c   :  { %1146 = vmatprep.subr.bf16.mxu0 %v1218_v15 }
 0x24f   :  { %1147 = vmatpush3.bf16.msra.mxu0 %v1214_v32 }
 0x2f2   :  { %v766_v33 = vpop.f32.mrf.mxu0  ;;  %v810_v34 = vpop.f32.mrf.mxu1 }
 0x2f3   :  { %v816_v35 = vpack.c.bf16 %v766_v33, %v766_v33 }
 0x2f4   :  { %v1110_v29 = vpop.f32.mrf.mxu0  ;;  %v1130_v36 = vpop.f32.mrf.mxu1 }
 0x2f5   :  { %1149 = vmatmul.mubr.bf16.vlgmr.msra.gmra.mxu0 %v816_v35 }
 0x2f6   :  { %v769_v39 = vpop.f32.mrf.mxu0  ;;  %v813_v41 = vpop.f32.mrf.mxu1 }
 0x2f8   :  { %v1111_v42 = vpop.f32.mrf.mxu0  ;;  %v1131_v43 = vpop.f32.mrf.mxu1 }
 0x3b5   :  { %v915_v15 = vpop.f32.mrf.mxu0 }
 0x3b6   :  { %v916_v51 = vadd.f32 %v915_v15, %v810_v34 }
 0x3b7   :  { %v1150_v27 = vpop.f32.mrf.mxu0 }
 0x3b8   :  { %v931_v10 = vadd.f32 %v930_v50, %v916_v51 }
 0x3b9   :  { %v918_v52 = vpop.f32.mrf.mxu0 }
 0x3ba   :  { %1215 = vtanh.f32 %v931_v10 }
 0x3bb   :  { %v1151_v54 = vpop.f32.mrf.mxu0 }
 0x3c7   :  { %v1216_v55 = vpop.eup %1215 }
 0x3c8   :  { %933 = vst [vmem:[%s1709_s10] sm:$0x1] %v1216_v55 }

// kernel: graph_unet_forward.9
= control target key start
LH: loop header
LB: loop body
LE: loop exit
PB: predicated region body
PF: predicated region fallthrough
CT: control target
= control target key end

     0   :  { %v867_v1 = vmov 0   ;;  %vm77_vm0 = vcmask 261120   ;;  %v868_v43 = vmov 0.0   ;;  %s1214_s3 = inlined_call_operand.vmem [shape: bf16[32,16], index: 3, kind: input, shape index: {}]   ;;  %s1215_s2 = inlined_call_operand.vmem [shape: f32[128,32], index: 2, kind: input, shape index: {}]   ;;  %s1216_s1 = inlined_call_operand.vmem [shape: f32[128,1], index: 1, kind: input, shape index: {}]   ;;  %s1217_s0 = inlined_call_operand.vmem [shape: bf16[128,128], index: 0, kind: input, shape index: {}]   ;;  %s1218_s4 = inlined_call_operand.vmem [shape: f32[1,16], index: 4, kind: input, shape index: {}]   ;;  %s1219_s5 = inlined_call_operand.vmem [shape: f32[128,16], index: 5, kind: output, shape index: {}]  }
   0x1   :  { %v857_v0 = vld [vmem:[%s1214_s3 + $0x8] sm:$0xff]   ;;  %815 = vset.pattern.permute.xlu0 %v867_v1  ;;  %816 = vset.pattern.permute.xlu1 %v867_v1  ;;  %v858_v2 = vld [vmem:[%s1214_s3] sm:$0xff]   ;;  %v39_v6 = vld [vmem:[%s1215_s2 + $0x10] sm:$0xff] }
   0x2   :  { %745 = vmatprep.subr.bf16.mxu0 %v857_v0  ;;  %v37_v3 = vld [vmem:[%s1215_s2] sm:$0xff]  ;;  %v38_v4 = vld [vmem:[%s1215_s2 + $0x8] sm:$0xff]  ;;  %v40_v7 = vld [vmem:[%s1215_s2 + $0x18] sm:$0xff] }
   0x3   :  { %746 = vmatpush3.bf16.msra.mxu0 %v857_v0  ;;  %v53_v5 = vpack.c.bf16 %v38_v4, %v37_v3  ;;  %v41_v8 = vld [vmem:[%s1215_s2 + $0x20] sm:$0xff]  ;;  %v42_v9 = vld [vmem:[%s1215_s2 + $0x28] sm:$0xff]  ;;  %v54_v10 = vpack.c.bf16 %v40_v7, %v39_v6  ;;  %v927_v12 = vld [vmem:[%s1216_s1 + $0x70] sm:$0xff] }
   0x4   :  { %747 = vmatprep.subr.bf16.mxu0 %v858_v2  ;;  %v55_v11 = vpack.c.bf16 %v42_v9, %v41_v8  ;;  %287 = vperm.xlu0 %815, %v927_v12   ;;  %v933_v13 = vld [vmem:[%s1216_s1 + $0x60] sm:$0xff]  ;;  %v938_v14 = vld [vmem:[%s1216_s1 + $0x78] sm:$0xff]  ;;  %v945_v15 = vld [vmem:[%s1216_s1 + $0x68] sm:$0xff]  ;;  %vm478_vm15 = vcmp.gt.f32.partialorder %v927_v12, 0.0 }
   0x5   :  { %749 = vmatprep.mubr.msk.bf16.mxu0 %vm77_vm0, %v53_v5  ;;  %277 = vperm.xlu1 %816, %v933_v13   ;;  %v43_v16 = vld [vmem:[%s1215_s2 + $0x30] sm:$0xff]  ;;  %v44_v17 = vld [vmem:[%s1215_s2 + $0x38] sm:$0xff]  ;;  %v45_v18 = vld [vmem:[%s1215_s2 + $0x40] sm:$0xff]  ;;  %vm476_vm13 = vcmp.gt.f32.partialorder %v933_v13, 0.0  ;;  %vm477_vm14 = vcmp.gt.f32.partialorder %v945_v15, 0.0  ;;  %v716_v0 = vsel %vm478_vm15, 1.0, %v868_v43 }
   0x6   :  { %v46_v19 = vld [vmem:[%s1215_s2 + $0x48] sm:$0xff]  ;;  %v965_v20 = vld [vmem:[%s1216_s1 + $0x50] sm:$0xff]  ;;  %v56_v21 = vpack.c.bf16 %v44_v17, %v43_v16  ;;  %v970_v22 = vld [vmem:[%s1216_s1 + $0x58] sm:$0xff]  ;;  %v714_v61 = vsel %vm476_vm13, 1.0, %v868_v43  ;;  %v715_v62 = vsel %vm477_vm14, 1.0, %v868_v43 }
   0x7   :  { %748 = vmatpush3.bf16.msra.mxu0 %v858_v2  ;;  %v57_v23 = vpack.c.bf16 %v46_v19, %v45_v18  ;;  %v29_v24 = vld [vmem:[%s1216_s1 + $0x40] sm:$0xff]  ;;  %v30_v25 = vld [vmem:[%s1216_s1 + $0x48] sm:$0xff]  ;;  %v47_v26 = vld [vmem:[%s1215_s2 + $0x50] sm:$0xff]  ;;  %vm474_vm11 = vcmp.gt.f32.partialorder %v965_v20, 0.0  ;;  %vm475_vm12 = vcmp.gt.f32.partialorder %v970_v22, 0.0  ;;  %v847_v2 = vpack.i.bf16 %v715_v62, %v714_v61 }
   0x8   :  { %292 = vperm.xlu0 %815, %v938_v14   ;;  %v48_v27 = vld [vmem:[%s1215_s2 + $0x58] sm:$0xff]  ;;  %v49_v28 = vld [vmem:[%s1215_s2 + $0x60] sm:$0xff]  ;;  %v50_v29 = vld [vmem:[%s1215_s2 + $0x68] sm:$0xff]  ;;  %vm472_vm9 = vcmp.gt.f32.partialorder %v29_v24, 0.0  ;;  %vm473_vm10 = vcmp.gt.f32.partialorder %v30_v25, 0.0  ;;  %v712_v58 = vsel %vm474_vm11, 1.0, %v868_v43 }
   0x9   :  { %282 = vperm.xlu1 %816, %v945_v15   ;;  %v27_v30 = vld [vmem:[%s1216_s1 + $0x30] sm:$0xff]  ;;  %v58_v31 = vpack.c.bf16 %v48_v27, %v47_v26  ;;  %v28_v32 = vld [vmem:[%s1216_s1 + $0x38] sm:$0xff]  ;;  %v59_v33 = vpack.c.bf16 %v50_v29, %v49_v28  ;;  %v25_v34 = vld [vmem:[%s1216_s1 + $0x20] sm:$0xff]  ;;  %v710_v55 = vsel %vm472_vm9, 1.0, %v868_v43  ;;  %v711_v56 = vsel %vm473_vm10, 1.0, %v868_v43 }
   0xa   :  { %750 = vmatmul.mubr.msk.bf16.vlgmr.msra.gmra.mxu0 %vm77_vm0, %v54_v10  ;;  %v26_v35 = vld [vmem:[%s1216_s1 + $0x28] sm:$0xff]  ;;  %v51_v36 = vld [vmem:[%s1215_s2 + $0x70] sm:$0xff]  ;;  %v52_v37 = vld [vmem:[%s1215_s2 + $0x78] sm:$0xff]  ;;  %vm468_vm5 = vcmp.gt.f32.partialorder %v25_v34, 0.0  ;;  %vm470_vm7 = vcmp.gt.f32.partialorder %v27_v30, 0.0  ;;  %vm471_vm8 = vcmp.gt.f32.partialorder %v28_v32, 0.0  ;;  %v837_v60 = vpack.i.bf16 %v711_v56, %v710_v55 }
   0xb   :  { %753 = vmatprep.mubr.msk.bf16.mxu0 %vm77_vm0, %v55_v11  ;;  %v23_v38 = vld [vmem:[%s1216_s1 + $0x10] sm:$0xff]  ;;  %v21_v39 = vld [vmem:[%s1216_s1] sm:$0xff]  ;;  %v22_v40 = vld [vmem:[%s1216_s1 + $0x8] sm:$0xff]  ;;  %v60_v41 = vpack.c.bf16 %v52_v37, %v51_v36  ;;  %vm469_vm6 = vcmp.gt.f32.partialorder %v26_v35, 0.0  ;;  %v706_v49 = vsel %vm468_vm5, 1.0, %v868_v43  ;;  %v708_v52 = vsel %vm470_vm7, 1.0, %v868_v43 }
   0xc   :  { %267 = vperm.xlu0 %815, %v965_v20   ;;  %v24_v42 = vld [vmem:[%s1216_s1 + $0x18] sm:$0xff]  ;;  %vm464_vm1 = vcmp.gt.f32.partialorder %v21_v39, 0.0  ;;  %vm465_vm2 = vcmp.gt.f32.partialorder %v22_v40, 0.0  ;;  %vm466_vm3 = vcmp.gt.f32.partialorder %v23_v38, 0.0  ;;  %v707_v50 = vsel %vm469_vm6, 1.0, %v868_v43  ;;  %v859_v4 = vld [vmem:[%s1217_s0] sm:$0xff]  }
   0xd   :  { %272 = vperm.xlu1 %816, %v970_v22   ;;  %vm467_vm4 = vcmp.gt.f32.partialorder %v24_v42, 0.0  ;;  %v702_v44 = vsel %vm464_vm1, 1.0, %v868_v43  ;;  %v703_v45 = vsel %vm465_vm2, 1.0, %v868_v43  ;;  %v704_v46 = vsel %vm466_vm3, 1.0, %v868_v43  ;;  %v860_v5 = vld [vmem:[%s1217_s0 + $0x10] sm:$0xff]   ;;  %v861_v62 = vld [vmem:[%s1217_s0 + $0x8] sm:$0xff]  }
   0xe   :  { %v705_v47 = vsel %vm467_vm4, 1.0, %v868_v43  ;;  %v817_v48 = vpack.i.bf16 %v703_v45, %v702_v44  ;;  %v709_v53 = vsel %vm471_vm8, 1.0, %v868_v43  ;;  %v827_v54 = vpack.i.bf16 %v707_v50, %v706_v49  ;;  %785 = vmatprep.mubr.bf16.mxu1 %v860_v5 }
   0xf   :  { %v822_v51 = vpack.i.bf16 %v705_v47, %v704_v46  ;;  %v832_v57 = vpack.i.bf16 %v709_v53, %v708_v52  ;;  %v713_v59 = vsel %vm475_vm12, 1.0, %v868_v43  ;;  %vm663_vm1 = vcmask 130048  }
  0x10   :  { %257 = vperm.xlu0 %815, %v29_v24   ;;  %v842_v63 = vpack.i.bf16 %v713_v59, %v712_v58 }
  0x11   :  { %262 = vperm.xlu1 %816, %v30_v25  }
  0x12   :  { %754 = vmatmul.mubr.msk.bf16.gmra.mxu0 %vm77_vm0, %v56_v21 }
  0x13   :  { %757 = vmatprep.mubr.msk.bf16.mxu0 %vm77_vm0, %v57_v23 }
  0x14   :  { %247 = vperm.xlu0 %815, %v27_v30  }
  0x15   :  { %252 = vperm.xlu1 %816, %v28_v32  }
  0x18   :  { %237 = vperm.xlu0 %815, %v25_v34  }
  0x19   :  { %242 = vperm.xlu1 %816, %v26_v35  }
  0x1a   :  { %758 = vmatmul.mubr.msk.bf16.gmra.mxu0 %vm77_vm0, %v58_v31 }
  0x1b   :  { %761 = vmatprep.mubr.msk.bf16.mxu0 %vm77_vm0, %v59_v33 }
  0x1c   :  { %227 = vperm.xlu0 %815, %v23_v38  }
  0x1d   :  { %232 = vperm.xlu1 %816, %v24_v42  }
  0x20   :  { %217 = vperm.xlu0 %815, %v21_v39  }
  0x21   :  { %222 = vperm.xlu1 %816, %v22_v40  }
  0x22   :  { %762 = vmatmul.mubr.msk.bf16.gmra.mxu0 %vm77_vm0, %v60_v41  ;;  %vm479_vm0 = vcmp.gt.f32.partialorder %v938_v14, 0.0 }
  0x23   :  { %v717_v1 = vsel %vm479_vm0, 1.0, %v868_v43  ;;  %781 = vmatprep.mubr.bf16.mxu0 %v859_v4 }
  0x24   :  { %818 = vperm.xlu0 %815, %v817_v48   ;;  %v852_v3 = vpack.i.bf16 %v717_v1, %v716_v0  ;;  %v863_v0 = vld [vmem:[%s1217_s0 + $0x20] sm:$0xff]   ;;  %v864_v1 = vld [vmem:[%s1217_s0 + $0x28] sm:$0xff]  }
  0x25   :  { %823 = vperm.xlu1 %816, %v822_v51  }
  0x28   :  { %828 = vperm.xlu0 %815, %v827_v54  }
  0x29   :  { %833 = vperm.xlu1 %816, %v832_v57  }
  0x2c   :  { %838 = vperm.xlu0 %815, %v837_v60  }
  0x2d   :  { %843 = vperm.xlu1 %816, %v842_v63   ;;  %v862_v63 = vld [vmem:[%s1217_s0 + $0x18] sm:$0xff]  }
  0x30   :  { %848 = vperm.xlu0 %815, %v847_v2   ;;  %v865_v2 = vld [vmem:[%s1217_s0 + $0x30] sm:$0xff]  }
  0x31   :  { %853 = vperm.xlu1 %816, %v852_v3   ;;  %v866_v3 = vld [vmem:[%s1217_s0 + $0x38] sm:$0xff]  }
  0x7f   :  { %v1049_v12 = vpop.permute.xlu0 %287 }
  0x80   :  { %v1047_v10 = vpop.permute.xlu1 %277 }
  0x83   :  { %v1053_v17 = vpop.permute.xlu0 %292 }
  0x84   :  { %v1051_v15 = vpop.permute.xlu1 %282 }
  0x87   :  { %v1057_v22 = vpop.permute.xlu0 %267 }
  0x88   :  { %v1055_v20 = vpop.permute.xlu1 %272 }
  0x8b   :  { %v1061_v27 = vpop.permute.xlu0 %257 }
  0x8c   :  { %v1059_v25 = vpop.permute.xlu1 %262 }
  0x8f   :  { %v1070_v38 = vpop.permute.xlu0 %247 }
  0x90   :  { %v1067_v35 = vpop.permute.xlu1 %252 }
  0x93   :  { %v1077_v44 = vpop.permute.xlu0 %237 }
  0x94   :  { %v1074_v42 = vpop.permute.xlu1 %242 }
  0x97   :  { %v228_v51 = vpop.permute.xlu0 %227 }
  0x98   :  { %v1081_v48 = vpop.permute.xlu1 %232 }
  0x9b   :  { %v218_v57 = vpop.permute.xlu0 %217 }
  0x9c   :  { %v1087_v55 = vpop.permute.xlu1 %222 }
  0x9f   :  { %v1111_v5 = vpop.permute.xlu0 %818 }
  0xa0   :  { %v824_v4 = vpop.permute.xlu1 %823 }
  0xca   :  { %v1039_v6 = vpop.f32.mrf.mxu0 }
  0xcb   :  { %v297_v56 = vmul.f32 %v1039_v6, %v228_v51 }
  0xcc   :  { %v1041_v7 = vpop.f32.mrf.mxu0 }
  0xcd   :  { %v295_v60 = vmul.f32 %v218_v57, %v1041_v7  ;;  %v1116_v7 = vld [vmem:[%s1218_s4] ss:$0 sm:$0xff] }
  0xce   :  { %v1043_v8 = vpop.f32.mrf.mxu0 }
  0xcf   :  { %v298_v53 = vmul.f32 %v1043_v8, %v1081_v48 }
  0xd0   :  { %v1045_v9 = vpop.f32.mrf.mxu0 }
  0xd1   :  { %v312_v58 = vpack.c.bf16 %v298_v53, %v297_v56  ;;  %v296_v59 = vmul.f32 %v1087_v55, %v1045_v9 }
  0xd2   :  { %v755_v11 = vpop.f32.mrf.mxu0 }
  0xd3   :  { %v301_v47 = vmul.f32 %v755_v11, %v1070_v38  ;;  %v311_v61 = vpack.c.bf16 %v296_v59, %v295_v60  ;;  %v821_v60 = vunpack.i.h.bf16 %v1111_v5 }
  0xd4   :  { %v152_v13 = vpop.f32.mrf.mxu0 }
  0xd5   :  { %v299_v52 = vmul.f32 %v1077_v44, %v152_v13 }
  0xd6   :  { %v756_v14 = vpop.f32.mrf.mxu0 }
  0xd7   :  { %v302_v45 = vmul.f32 %v756_v14, %v1067_v35 }
  0xd8   :  { %v155_v16 = vpop.f32.mrf.mxu0 }
  0xd9   :  { %v314_v49 = vpack.c.bf16 %v302_v45, %v301_v47  ;;  %v300_v50 = vmul.f32 %v1074_v42, %v155_v16  ;;  %v834_v16 = vpop.permute.xlu1 %833 }
  0xda   :  { %v759_v18 = vpop.f32.mrf.mxu0 }
  0xdb   :  { %v305_v39 = vmul.f32 %v759_v18, %v1057_v22  ;;  %v313_v54 = vpack.c.bf16 %v300_v50, %v299_v52 }
  0xdc   :  { %v168_v19 = vpop.f32.mrf.mxu0 }
  0xdd   :  { %v303_v43 = vmul.f32 %v1061_v27, %v168_v19 }
  0xde   :  { %v760_v21 = vpop.f32.mrf.mxu0 }
  0xdf   :  { %v306_v36 = vmul.f32 %v760_v21, %v1055_v20 }
  0xe0   :  { %v171_v23 = vpop.f32.mrf.mxu0 }
  0xe1   :  { %v316_v40 = vpack.c.bf16 %v306_v36, %v305_v39  ;;  %v304_v41 = vmul.f32 %v1059_v25, %v171_v23 }
  0xe2   :  { %v763_v24 = vpop.f32.mrf.mxu0 }
  0xe3   :  { %v309_v29 = vmul.f32 %v763_v24, %v1049_v12  ;;  %v315_v46 = vpack.c.bf16 %v304_v41, %v303_v43  ;;  %v820_v24 = vunpack.i.l.bf16 %v1111_v5 }
  0xe4   :  { %v184_v26 = vpop.f32.mrf.mxu0 }
  0xe5   :  { %v307_v32 = vmul.f32 %v1047_v10, %v184_v26  ;;  %v826_v26 = vunpack.i.h.bf16 %v824_v4 }
  0xe6   :  { %v764_v28 = vpop.f32.mrf.mxu0 }
  0xe7   :  { %v310_v30 = vmul.f32 %v764_v28, %v1053_v17  ;;  %v825_v28 = vunpack.i.l.bf16 %v824_v4 }
  0xe8   :  { %v187_v31 = vpop.f32.mrf.mxu0 }
  0xe9   :  { %v318_v33 = vpack.c.bf16 %v310_v30, %v309_v29  ;;  %v308_v34 = vmul.f32 %v1051_v15, %v187_v31  ;;  %v835_v29 = vunpack.i.l.bf16 %v834_v16 }
  0xeb   :  { %v317_v37 = vpack.c.bf16 %v308_v34, %v307_v32  ;;  %765 = vmatprep.subr.bf16.mxu0 %v318_v33  ;;  %797 = vmatprep.subr.bf16.mxu1 %v318_v33  ;;  %v829_v32 = vpop.permute.xlu0 %828 }
  0xec   :  { %766 = vmatpush3.bf16.msra.mxu0 %v318_v33  ;;  %805 = vmatpush3.bf16.msra.mxu1 %v318_v33 }
  0xed   :  { %767 = vmatprep.subr.bf16.mxu0 %v317_v37  ;;  %798 = vmatprep.subr.bf16.mxu1 %v317_v37 }
  0xef   :  { %v839_v5 = vpop.permute.xlu0 %838 }
  0xf0   :  { %768 = vmatpush3.bf16.msra.mxu0 %v317_v37  ;;  %806 = vmatpush3.bf16.msra.mxu1 %v317_v37 }
  0xf1   :  { %769 = vmatprep.subr.bf16.mxu0 %v316_v40  ;;  %799 = vmatprep.subr.bf16.mxu1 %v316_v40 }
  0xf4   :  { %770 = vmatpush3.bf16.msra.mxu0 %v316_v40  ;;  %807 = vmatpush3.bf16.msra.mxu1 %v316_v40 }
  0xf5   :  { %771 = vmatprep.subr.bf16.mxu0 %v315_v46  ;;  %800 = vmatprep.subr.bf16.mxu1 %v315_v46 }
  0xf8   :  { %772 = vmatpush3.bf16.msra.mxu0 %v315_v46  ;;  %808 = vmatpush3.bf16.msra.mxu1 %v315_v46 }
  0xf9   :  { %773 = vmatprep.subr.bf16.mxu0 %v314_v49  ;;  %801 = vmatprep.subr.bf16.mxu1 %v314_v49 }
  0xfc   :  { %774 = vmatpush3.bf16.msra.mxu0 %v314_v49  ;;  %809 = vmatpush3.bf16.msra.mxu1 %v314_v49 }
  0xfd   :  { %775 = vmatprep.subr.bf16.mxu0 %v313_v54  ;;  %802 = vmatprep.subr.bf16.mxu1 %v313_v54 }
 0x100   :  { %776 = vmatpush3.bf16.msra.mxu0 %v313_v54  ;;  %810 = vmatpush3.bf16.msra.mxu1 %v313_v54  ;;  %v836_v54 = vunpack.i.h.bf16 %v834_v16 }
 0x101   :  { %777 = vmatprep.subr.bf16.mxu0 %v312_v58  ;;  %803 = vmatprep.subr.bf16.mxu1 %v312_v58 }
 0x104   :  { %778 = vmatpush3.bf16.msra.mxu0 %v312_v58  ;;  %811 = vmatpush3.bf16.msra.mxu1 %v312_v58 }
 0x105   :  { %779 = vmatprep.subr.bf16.mxu0 %v311_v61  ;;  %804 = vmatprep.subr.bf16.mxu1 %v311_v61 }
 0x108   :  { %780 = vmatpush3.bf16.msra.mxu0 %v311_v61  ;;  %812 = vmatpush3.bf16.msra.mxu1 %v311_v61  ;;  %v831_v61 = vunpack.i.h.bf16 %v829_v32 }
 0x10b   :  { %782 = vmatmul.mubr.bf16.vlgmr.msra.gmra.mxu0 %v861_v62  ;;  %786 = vmatmul.mubr.bf16.vlgmr.msra.gmra.mxu1 %v862_v63  ;;  %v844_v62 = vpop.permute.xlu1 %843 }
 0x10c   :  { %789 = vmatprep.mubr.bf16.mxu1 %v863_v0 }
 0x113   :  { %790 = vmatmul.mubr.bf16.gmra.mxu1 %v864_v1 }
 0x114   :  { %793 = vmatprep.mubr.bf16.mxu1 %v865_v2 }
 0x11b   :  { %794 = vmatmul.mubr.bf16.gmra.mxu1 %v866_v3 }
 0x1cb   :  { %v783_v6 = vpop.f32.mrf.mxu0  ;;  %v787_v8 = vpop.f32.mrf.mxu1 }
 0x1cc   :  { %v514_v9 = vmul.f32 %v783_v6, %v228_v51  ;;  %v518_v11 = vmul.f32 %v787_v8, %v1070_v38  ;;  %v830_v38 = vunpack.i.l.bf16 %v829_v32  ;;  %v845_v6 = vunpack.i.l.bf16 %v844_v62 }
 0x1cd   :  { %v401_v13 = vpop.f32.mrf.mxu0  ;;  %v417_v14 = vpop.f32.mrf.mxu1 }
 0x1ce   :  { %v537_v18 = vadd.f32 %v1116_v7, %v514_v9  ;;  %v541_v19 = vadd.f32 %v1116_v7, %v518_v11  ;;  %v512_v21 = vmul.f32 %v401_v13, %v218_v57  ;;  %v516_v23 = vmul.f32 %v417_v14, %v1077_v44 }
 0x1cf   :  { %v784_v30 = vpop.f32.mrf.mxu0  ;;  %v788_v31 = vpop.f32.mrf.mxu1  ;;  %v840_v13 = vunpack.i.l.bf16 %v839_v5 }
 0x1d0   :  { %v553_v33 = vmax.f32 %v537_v18, 0.0  ;;  %v557_v34 = vmax.f32 %v541_v19, 0.0  ;;  %v535_v36 = vadd.f32 %v1116_v7, %v512_v21  ;;  %v539_v37 = vadd.f32 %v1116_v7, %v516_v23 }
 0x1d1   :  { %v515_v39 = vmul.f32 %v784_v30, %v1081_v48  ;;  %v519_v40 = vmul.f32 %v788_v31, %v1067_v35  ;;  %v404_v41 = vpop.f32.mrf.mxu0  ;;  %v420_v43 = vpop.f32.mrf.mxu1  ;;  %v846_v23 = vunpack.i.h.bf16 %v844_v62  ;;  %v841_v31 = vunpack.i.h.bf16 %v839_v5 }
 0x1d2   :  { %v649_v44 = vmul.f32 %v825_v28, %v553_v33  ;;  %v653_v45 = vmul.f32 %v835_v29, %v557_v34  ;;  %v551_v46 = vmax.f32 %v535_v36, 0.0  ;;  %v555_v47 = vmax.f32 %v539_v37, 0.0  ;;  %v849_v33 = vpop.permute.xlu0 %848 }
 0x1d3   :  { %v538_v49 = vadd.f32 %v1116_v7, %v515_v39  ;;  %v542_v50 = vadd.f32 %v1116_v7, %v519_v40  ;;  %v513_v51 = vmul.f32 %v404_v41, %v1087_v55  ;;  %v517_v52 = vmul.f32 %v420_v43, %v1074_v42  ;;  %v791_v53 = vpop.f32.mrf.mxu1 }
 0x1d4   :  { %666 = vst.msk [vmem:[%s1219_s5 + $0x10] sm:$0xff] %vm663_vm1, %v649_v44  ;;  %670 = vst.msk [vmem:[%s1219_s5 + $0x30] sm:$0xff] %vm663_vm1, %v653_v45  ;;  %v647_v35 = vmul.f32 %v820_v24, %v551_v46  ;;  %v651_v48 = vmul.f32 %v830_v38, %v555_v47  ;;  %v522_v56 = vmul.f32 %v791_v53, %v1057_v22  ;;  %v850_v45 = vunpack.i.l.bf16 %v849_v33 }
 0x1d5   :  { %v554_v57 = vmax.f32 %v538_v49, 0.0  ;;  %v558_v55 = vmax.f32 %v542_v50, 0.0  ;;  %v536_v42 = vadd.f32 %v1116_v7, %v513_v51  ;;  %v540_v58 = vadd.f32 %v1116_v7, %v517_v52  ;;  %v433_v59 = vpop.f32.mrf.mxu1 }
 0x1d6   :  { %664 = vst.msk [vmem:[%s1219_s5] sm:$0xff] %vm663_vm1, %v647_v35  ;;  %668 = vst.msk [vmem:[%s1219_s5 + $0x20] sm:$0xff] %vm663_vm1, %v651_v48  ;;  %v545_v22 = vadd.f32 %v1116_v7, %v522_v56  ;;  %v520_v63 = vmul.f32 %v433_v59, %v1061_v27 }
 0x1d7   :  { %v650_v0 = vmul.f32 %v826_v26, %v554_v57  ;;  %v654_v1 = vmul.f32 %v836_v54, %v558_v55  ;;  %v552_v2 = vmax.f32 %v536_v42, 0.0  ;;  %v556_v3 = vmax.f32 %v540_v58, 0.0  ;;  %v792_v4 = vpop.f32.mrf.mxu1  ;;  %v854_v26 = vpop.permute.xlu1 %853 }
 0x1d8   :  { %v561_v8 = vmax.f32 %v545_v22, 0.0  ;;  %v543_v9 = vadd.f32 %v1116_v7, %v520_v63  ;;  %v523_v11 = vmul.f32 %v792_v4, %v1055_v20  ;;  %v855_v39 = vunpack.i.l.bf16 %v854_v26 }
 0x1d9   :  { %667 = vst.msk [vmem:[%s1219_s5 + $0x18] sm:$0xff] %vm663_vm1, %v650_v0  ;;  %671 = vst.msk [vmem:[%s1219_s5 + $0x38] sm:$0xff] %vm663_vm1, %v654_v1  ;;  %v648_v27 = vmul.f32 %v821_v60, %v552_v2  ;;  %v652_v14 = vmul.f32 %v831_v61, %v556_v3  ;;  %v436_v16 = vpop.f32.mrf.mxu1  ;;  %v856_v51 = vunpack.i.h.bf16 %v854_v26  ;;  %v851_v54 = vunpack.i.h.bf16 %v849_v33 }
 0x1da   :  { %v657_v18 = vmul.f32 %v845_v6, %v561_v8  ;;  %v559_v19 = vmax.f32 %v543_v9, 0.0  ;;  %v546_v21 = vadd.f32 %v1116_v7, %v523_v11  ;;  %v521_v20 = vmul.f32 %v436_v16, %v1059_v25 }
 0x1db   :  { %665 = vst.msk [vmem:[%s1219_s5 + $0x8] sm:$0xff] %vm663_vm1, %v648_v27  ;;  %669 = vst.msk [vmem:[%s1219_s5 + $0x28] sm:$0xff] %vm663_vm1, %v652_v14  ;;  %v795_v24 = vpop.f32.mrf.mxu1 }
 0x1dc   :  { %674 = vst.msk [vmem:[%s1219_s5 + $0x50] sm:$0xff] %vm663_vm1, %v657_v18  ;;  %v655_v28 = vmul.f32 %v840_v13, %v559_v19  ;;  %v562_v25 = vmax.f32 %v546_v21, 0.0  ;;  %v544_v29 = vadd.f32 %v1116_v7, %v521_v20  ;;  %v526_v30 = vmul.f32 %v795_v24, %v1049_v12 }
 0x1dd   :  { %v449_v32 = vpop.f32.mrf.mxu1 }
 0x1de   :  { %672 = vst.msk [vmem:[%s1219_s5 + $0x40] sm:$0xff] %vm663_vm1, %v655_v28  ;;  %v658_v34 = vmul.f32 %v846_v23, %v562_v25  ;;  %v560_v36 = vmax.f32 %v544_v29, 0.0  ;;  %v549_v37 = vadd.f32 %v1116_v7, %v526_v30  ;;  %v524_v38 = vmul.f32 %v449_v32, %v1047_v10 }
 0x1df   :  { %v796_v40 = vpop.f32.mrf.mxu1 }
 0x1e0   :  { %675 = vst.msk [vmem:[%s1219_s5 + $0x58] sm:$0xff] %vm663_vm1, %v658_v34  ;;  %v656_v12 = vmul.f32 %v841_v31, %v560_v36  ;;  %v565_v41 = vmax.f32 %v549_v37, 0.0  ;;  %v547_v43 = vadd.f32 %v1116_v7, %v524_v38  ;;  %v527_v44 = vmul.f32 %v796_v40, %v1053_v17 }
 0x1e1   :  { %v452_v46 = vpop.f32.mrf.mxu1 }
 0x1e2   :  { %673 = vst.msk [vmem:[%s1219_s5 + $0x48] sm:$0xff] %vm663_vm1, %v656_v12  ;;  %v661_v10 = vmul.f32 %v855_v39, %v565_v41  ;;  %v563_v47 = vmax.f32 %v547_v43, 0.0  ;;  %v550_v49 = vadd.f32 %v1116_v7, %v527_v44  ;;  %v525_v50 = vmul.f32 %v452_v46, %v1051_v15 }
 0x1e4   :  { %678 = vst.msk [vmem:[%s1219_s5 + $0x70] sm:$0xff] %vm663_vm1, %v661_v10  ;;  %v659_v17 = vmul.f32 %v850_v45, %v563_v47  ;;  %v566_v52 = vmax.f32 %v550_v49, 0.0  ;;  %v548_v53 = vadd.f32 %v1116_v7, %v525_v50 }
 0x1e6   :  { %676 = vst.msk [vmem:[%s1219_s5 + $0x60] sm:$0xff] %vm663_vm1, %v659_v17  ;;  %v662_v35 = vmul.f32 %v856_v51, %v566_v52  ;;  %v564_v48 = vmax.f32 %v548_v53, 0.0 }
 0x1e8   :  { %679 = vst.msk [vmem:[%s1219_s5 + $0x78] sm:$0xff] %vm663_vm1, %v662_v35  ;;  %v660_v15 = vmul.f32 %v851_v54, %v564_v48 }
 0x1ea   :  { %677 = vst.msk [vmem:[%s1219_s5 + $0x68] sm:$0xff] %vm663_vm1, %v660_v15 }

</bundles_post_ra>
